<compile_context>
chip_gen: v7x
topology: tpu7x:2x2x1
jax: 0.10.0
libtpu: 0.0.40
codegen_flags: <defaults>
</compile_context>

<pallas_src>
import functools

import jax
import jax.numpy as jnp
from jax.experimental import pallas as pl
from jax.experimental.pallas import tpu as pltpu


# ---------------------------------------------------------------------------
# Fused kernel: grid = (num_layers,); h / vn persist in VMEM scratch across layers.
# ---------------------------------------------------------------------------
def fused_gnn_kernel(eps_ref,                        # (L,)  SMEM  per-layer GIN eps
                     h0_hbm,                         # (N, D) HBM  atom-encoder output
                     g_ref,                          # (E, N) bf16 one_hot(src)
                     sT_ref,                         # (N, E) bf16 one_hot(dst)^T
                     p_ref,                          # (N, B) bf16 one_hot(batch)
                     pT_ref,                         # (B, N) bf16 one_hot(batch)^T
                     eemb_ref,                       # (1, E, D) bf16 bond embeddings
                     w1_ref, b1_ref, w2_ref, b2_ref,  # GIN MLP (+BN folded), layer l
                     v1_ref, c1_ref, v2_ref, c2_ref,  # virtual-node MLP (+BN folded)
                     wp_ref, bp_ref,                 # prediction head (f32)
                     out_ref,                        # (B, T_pad) clamped predictions
                     h_sc, vn_sc,                    # VMEM scratch, resident across grid
                     *, num_layers):
    l = pl.program_id(0)
    f32 = jnp.float32
    bf16 = jnp.bfloat16

    @pl.when(l == 0)
    def _init():
        # One-time DMA of the atom-encoder output into the resident node-feature
        # scratch (h0 never re-DMAs and is not double-buffered).
        pltpu.sync_copy(h0_hbm, h_sc)
        vn_sc[...] = jnp.zeros_like(vn_sc)           # virtualnode_embedding init = 0

    vn = vn_sc[...]                                                  # (B, D) f32
    # h_list[layer] = h_list[layer] + virtualnode_embedding[batch_id]
    # lane-dense bf16 one-hot x bf16 vn, f32 accumulation (exact 0/1 selection).
    h = h_sc[...] + jnp.dot(p_ref[...], vn.astype(bf16),
                            preferred_element_type=f32)             # (N, D) f32
    h_bf = h.astype(bf16)

    # GINConv message passing: m = relu(h[src] + bond_emb); new_x = sum over incoming.
    m = jnp.maximum(
        jnp.dot(g_ref[...], h_bf, preferred_element_type=f32)
        + eemb_ref[0].astype(f32), 0.0)                              # (E, D) f32
    # scatter-sum == one_hot(dst)^T @ m, pre-transposed on host -> plain jnp.dot.
    new_x = jnp.dot(sT_ref[...], m.astype(bf16),
                    preferred_element_type=f32)                      # (N, D) f32

    # GIN MLP (Linear-BN-ReLU-Linear) + outer BatchNorm; BN/bias folded into w*/b*.
    x = h * (1.0 + eps_ref[l]) + new_x
    z = jnp.maximum(
        jnp.dot(x.astype(bf16), w1_ref[0], preferred_element_type=f32) + b1_ref[0],
        0.0)
    hn = jnp.dot(z.astype(bf16), w2_ref[0], preferred_element_type=f32) + b2_ref[0]

    @pl.when(l < num_layers - 1)
    def _not_last():
        h_sc[...] = jnp.maximum(hn, 0.0)             # ReLU; dropout == identity (eval)
        # Virtual-node update uses the *pre-conv* (vn-augmented) node features h.
        pooled = jnp.dot(pT_ref[...], h_bf, preferred_element_type=f32) + vn  # (B, D)
        a = jnp.maximum(
            jnp.dot(pooled.astype(bf16), v1_ref[0],
                    preferred_element_type=f32) + c1_ref[0], 0.0)
        vn_sc[...] = jnp.maximum(
            jnp.dot(a.astype(bf16), v2_ref[0],
                    preferred_element_type=f32) + c2_ref[0], 0.0)

    @pl.when(l == num_layers - 1)
    def _last():
        # JK='last'; SumPooling + graph_pred_linear + clamp(0, 50) (GNN eval path).
        hg = jnp.dot(pT_ref[...], hn.astype(bf16),
                     preferred_element_type=f32)                     # (B, D) f32
        pred = jnp.dot(hg, wp_ref[...], preferred_element_type=f32) + bp_ref[...]
        out_ref[...] = jnp.clip(pred, 0.0, 50.0)


# ---------------------------------------------------------------------------
# Wrapper: one pallas_call over layers, constant operands DMA'd once (index unchanged).
# ---------------------------------------------------------------------------
def gnn_fused_forward(eps, h0, g_src, s_dstT, p_pool, p_poolT, eemb,
                      w1, b1, w2, b2, v1, c1, v2, c2, w_pred, b_pred, *, num_layers):
    n_pad, d_pad = h0.shape
    e_pad = g_src.shape[0]
    b_pad = p_poolT.shape[0]
    t_pad = w_pred.shape[1]

    def const2(l, eps_ref):       # whole array, same block every layer
        return (0, 0)

    def per_layer3(l, eps_ref):   # stacked (L, ., .) arrays, pick layer l
        return (l, 0, 0)

    grid_spec = pltpu.PrefetchScalarGridSpec(
        num_scalar_prefetch=1,                          # eps -> SMEM
        grid=(num_layers,),
        in_specs=[
            pl.BlockSpec(memory_space=pl.ANY),              # h0 (HBM, DMA'd at l==0)
            pl.BlockSpec((e_pad, n_pad), const2),           # one_hot(src)     bf16
            pl.BlockSpec((n_pad, e_pad), const2),           # one_hot(dst)^T   bf16
            pl.BlockSpec((n_pad, b_pad), const2),           # one_hot(batch)   bf16
            pl.BlockSpec((b_pad, n_pad), const2),           # one_hot(batch)^T bf16
            pl.BlockSpec((1, e_pad, d_pad), per_layer3),    # bond embeddings  bf16
            pl.BlockSpec((1, d_pad, d_pad), per_layer3),    # w1 (BN folded)   bf16
            pl.BlockSpec((1, 1, d_pad), per_layer3),        # b1               f32
            pl.BlockSpec((1, d_pad, d_pad), per_layer3),    # w2               bf16
            pl.BlockSpec((1, 1, d_pad), per_layer3),        # b2               f32
            pl.BlockSpec((1, d_pad, d_pad), per_layer3),    # vn w1            bf16
            pl.BlockSpec((1, 1, d_pad), per_layer3),        # vn b1            f32
            pl.BlockSpec((1, d_pad, d_pad), per_layer3),    # vn w2            bf16
            pl.BlockSpec((1, 1, d_pad), per_layer3),        # vn b2            f32
            pl.BlockSpec((d_pad, t_pad), const2),           # graph_pred weight f32
            pl.BlockSpec((1, t_pad), const2),               # graph_pred bias   f32
        ],
        out_specs=pl.BlockSpec((b_pad, t_pad), const2),
        scratch_shapes=[pltpu.VMEM((n_pad, d_pad), jnp.float32),   # node features h
                        pltpu.VMEM((b_pad, d_pad), jnp.float32)],  # virtual-node emb
    )
    kern = functools.partial(fused_gnn_kernel, num_layers=num_layers)
    return pl.pallas_call(
        kern,
        grid_spec=grid_spec,
        out_shape=jax.ShapeDtypeStruct((b_pad, t_pad), jnp.float32),
        compiler_params=pltpu.CompilerParams(
            dimension_semantics=("arbitrary",)),       # layer l+1 depends on layer l
    )(eps, h0, g_src, s_dstT, p_pool, p_poolT, eemb,
      w1, b1, w2, b2, v1, c1, v2, c2, w_pred, b_pred)


# ---------------------------------------------------------------------------
# Host-side glue: embedding-table gathers, BN folding, padding.
# ---------------------------------------------------------------------------
def multi_embedding_sum(tables, idx):
    out = jnp.zeros((idx.shape[0], tables[0].shape[1]), jnp.float32)
    for k, tab in enumerate(tables):
        out = out + jnp.take(tab, idx[:, k], axis=0)
    return out


def fold_linear_bn(w, b, bnp, bn_eps=1e-5):
    """BN_eval(x @ w + b) == x @ (w*s) + ((b - mean)*s + beta),  s = gamma/sqrt(var+eps)."""
    s = bnp["gamma"] / jnp.sqrt(bnp["var"] + bn_eps)
    return w * s[None, :], (b - bnp["mean"]) * s + bnp["beta"]


def pad2(x, rows, cols):
    return jnp.pad(x, ((0, rows - x.shape[0]), (0, cols - x.shape[1])))


# ---------------------------------------------------------------------------
# Pure-JAX reference (index-based gather / segment_sum, eval-mode torch semantics).
# ---------------------------------------------------------------------------
def gnn_reference(x_atoms, edge_attr, src, dst, batch_id, raw, num_layers, num_graphs):
    def bn(x, p):
        return (x - p["mean"]) * p["gamma"] / jnp.sqrt(p["var"] + 1e-5) + p["beta"]

    h = multi_embedding_sum(raw["atom_tables"], x_atoms)
    n = h.shape[0]
    vn = jnp.zeros((num_graphs, h.shape[1]), jnp.float32)
    for layer in range(num_layers):
        lp = raw["layers"][layer]
        h = h + vn[batch_id]
        eemb = multi_embedding_sum(lp["bond_tables"], edge_attr)
        m = jax.nn.relu(h[src] + eemb)
        new_x = jax.ops.segment_sum(m, dst, num_segments=n)
        x = (1.0 + lp["eps"]) * h + new_x
        z = jax.nn.relu(bn(jnp.dot(x, lp["w1"]) + lp["b1"], lp["bn1"]))
        hn = bn(jnp.dot(z, lp["w2"]) + lp["b2"], lp["bn_out"])
        if layer < num_layers - 1:
            vp = raw["vn"][layer]
            pooled = jax.ops.segment_sum(h, batch_id, num_segments=num_graphs) + vn
            a = jax.nn.relu(bn(jnp.dot(pooled, vp["w1"]) + vp["b1"], vp["bn1"]))
            vn = jax.nn.relu(bn(jnp.dot(a, vp["w2"]) + vp["b2"], vp["bn2"]))
            h = jax.nn.relu(hn)
        else:
            h = hn
    hg = jax.ops.segment_sum(h, batch_id, num_segments=num_graphs)
    out = jnp.dot(hg, raw["w_pred"]) + raw["b_pred"]
    return jnp.clip(out, 0.0, 50.0)


# ---------------------------------------------------------------------------
if __name__ == "__main__":
    key = jax.random.PRNGKey(0)

    NUM_LAYERS = 3          # module requires >= 2
    D = 32                  # emb_dim
    T = 1                   # num_tasks
    B = 2                   # graphs per batch
    NODES_PER_GRAPH = 6
    EDGES_PER_GRAPH = 12
    N = B * NODES_PER_GRAPH
    E = B * EDGES_PER_GRAPH

    # lane/sublane-friendly padded sizes (everything lane-dense, 128x128 MXU tiles)
    D_PAD, T_PAD, N_PAD, E_PAD, B_PAD = 128, 128, 128, 128, 128

    full_atom_feature_dims = [10, 4, 6]
    full_bond_feature_dims = [5, 3]

    keys = iter(jax.random.split(key, 256))

    def nk():
        return next(keys)

    def xavier(shape):
        fan_in, fan_out = shape
        lim = (6.0 / (fan_in + fan_out)) ** 0.5
        return jax.random.uniform(nk(), shape, jnp.float32, -lim, lim)

    def linear_params(d_in, d_out):
        # torch nn.Linear default init: U(-1/sqrt(fan_in), 1/sqrt(fan_in))
        lim = 1.0 / (d_in ** 0.5)
        w = jax.random.uniform(nk(), (d_in, d_out), jnp.float32, -lim, lim)
        b = jax.random.uniform(nk(), (d_out,), jnp.float32, -lim, lim)
        return w, b

    def bn_params(d):
        return dict(gamma=jax.random.uniform(nk(), (d,), jnp.float32, 0.8, 1.2),
                    beta=0.1 * jax.random.normal(nk(), (d,), jnp.float32),
                    mean=jnp.zeros((d,), jnp.float32),   # eval: running stats
                    var=jnp.ones((d,), jnp.float32))

    # ---- graph structure (edges stay inside their own graph) ----
    src_parts, dst_parts = [], []
    for gidx in range(B):
        src_parts.append(jax.random.randint(nk(), (EDGES_PER_GRAPH,), 0, NODES_PER_GRAPH)
                         + gidx * NODES_PER_GRAPH)
        dst_parts.append(jax.random.randint(nk(), (EDGES_PER_GRAPH,), 0, NODES_PER_GRAPH)
                         + gidx * NODES_PER_GRAPH)
    src = jnp.concatenate(src_parts).astype(jnp.int32)
    dst = jnp.concatenate(dst_parts).astype(jnp.int32)
    batch_id = jnp.repeat(jnp.arange(B, dtype=jnp.int32), NODES_PER_GRAPH)

    x_atoms = jnp.stack([jax.random.randint(nk(), (N,), 0, d)
                         for d in full_atom_feature_dims], axis=1).astype(jnp.int32)
    edge_attr = jnp.stack([jax.random.randint(nk(), (E,), 0, d)
                           for d in full_bond_feature_dims], axis=1).astype(jnp.int32)

    # ---- raw (unfolded) parameters, used by the pure-JAX reference ----
    raw = dict(atom_tables=[xavier((d, D)) for d in full_atom_feature_dims],
               layers=[], vn=[])
    for _ in range(NUM_LAYERS):
        w1r, b1r = linear_params(D, D)
        w2r, b2r = linear_params(D, D)
        raw["layers"].append(dict(
            bond_tables=[xavier((d, D)) for d in full_bond_feature_dims],
            eps=0.0,                                  # GIN eps init = 0
            w1=w1r, b1=b1r, bn1=bn_params(D),
            w2=w2r, b2=b2r, bn_out=bn_params(D)))     # outer GNN_node BatchNorm
    for _ in range(NUM_LAYERS - 1):
        w1r, b1r = linear_params(D, D)
        w2r, b2r = linear_params(D, D)
        raw["vn"].append(dict(w1=w1r, b1=b1r, bn1=bn_params(D),
                              w2=w2r, b2=b2r, bn2=bn_params(D)))
    raw["w_pred"], raw["b_pred"] = linear_params(D, T)

    # ---- fold BN + bias into weights, pad, stack per layer for the kernel ----
    bf16 = jnp.bfloat16
    w1s, b1s, w2s, b2s, eembs = [], [], [], [], []
    for lp in raw["layers"]:
        w1f, b1f = fold_linear_bn(lp["w1"], lp["b1"], lp["bn1"])
        w2f, b2f = fold_linear_bn(lp["w2"], lp["b2"], lp["bn_out"])
        w1s.append(pad2(w1f, D_PAD, D_PAD).astype(bf16))
        b1s.append(pad2(b1f[None, :], 1, D_PAD))
        w2s.append(pad2(w2f, D_PAD, D_PAD).astype(bf16))
        b2s.append(pad2(b2f[None, :], 1, D_PAD))
        eembs.append(pad2(multi_embedding_sum(lp["bond_tables"], edge_attr),
                          E_PAD, D_PAD).astype(bf16))
    v1s, c1s, v2s, c2s = [], [], [], []
    for vp in raw["vn"]:
        v1f, c1f = fold_linear_bn(vp["w1"], vp["b1"], vp["bn1"])
        v2f, c2f = fold_linear_bn(vp["w2"], vp["b2"], vp["bn2"])
        v1s.append(pad2(v1f, D_PAD, D_PAD).astype(bf16))
        c1s.append(pad2(c1f[None, :], 1, D_PAD))
        v2s.append(pad2(v2f, D_PAD, D_PAD).astype(bf16))
        c2s.append(pad2(c2f[None, :], 1, D_PAD))
    # pad vn params to NUM_LAYERS entries (last layer has no vn update; gated in-kernel)
    zmat = jnp.zeros((D_PAD, D_PAD), bf16)
    zvec = jnp.zeros((1, D_PAD), jnp.float32)
    v1s.append(zmat); c1s.append(zvec); v2s.append(zmat); c2s.append(zvec)

    w1 = jnp.stack(w1s); b1 = jnp.stack(b1s); w2 = jnp.stack(w2s); b2 = jnp.stack(b2s)
    v1 = jnp.stack(v1s); c1 = jnp.stack(c1s); v2 = jnp.stack(v2s); c2 = jnp.stack(c2s)
    eemb = jnp.stack(eembs)
    eps_arr = jnp.array([lp["eps"] for lp in raw["layers"]], jnp.float32)

    # node features + bf16 one-hot message-passing matrices (0/1 exact in bf16).
    # scatter/pool one-hots are pre-transposed on the host so the kernel never does a
    # dim-0 contraction (no in-kernel XLU transposes); B padded to 128 -> lane-dense.
    h0 = pad2(multi_embedding_sum(raw["atom_tables"], x_atoms), N_PAD, D_PAD)
    g_src = pad2(jax.nn.one_hot(src, N_PAD, dtype=bf16), E_PAD, N_PAD)      # (E, N)
    s_dstT = pad2(jax.nn.one_hot(dst, N_PAD, dtype=bf16), E_PAD, N_PAD).T   # (N, E)
    p_pool = pad2(jax.nn.one_hot(batch_id, B_PAD, dtype=bf16), N_PAD, B_PAD)  # (N, B)
    p_poolT = p_pool.T                                                        # (B, N)
    w_pred = pad2(raw["w_pred"], D_PAD, T_PAD)
    b_pred = pad2(raw["b_pred"][None, :], 1, T_PAD)

    # ---- run fused Pallas kernel ----
    out_pad = gnn_fused_forward(eps_arr, h0, g_src, s_dstT, p_pool, p_poolT, eemb,
                                w1, b1, w2, b2, v1, c1, v2, c2, w_pred, b_pred,
                                num_layers=NUM_LAYERS)
    out_pad = jax.block_until_ready(out_pad)
    out = out_pad[:B, :T]

    # ---- check against pure-JAX f32 reference ----
    with jax.default_matmul_precision("float32"):
        ref = gnn_reference(x_atoms, edge_attr, src, dst, batch_id, raw, NUM_LAYERS, B)
    ref = jax.block_until_ready(ref)
    err = float(jnp.max(jnp.abs(out - ref)))
    ref_mag = float(jnp.max(jnp.abs(ref)))
    # bf16 weights/activations (f32 accumulation) -> relative tolerance vs f32 reference
    tol = 0.05 * max(1.0, ref_mag) + 0.1
    assert out.shape == (B, T)
    assert bool(jnp.all(jnp.isfinite(out)))
    assert err < tol, f"max |pallas - reference| = {err} (tol {tol}, ref_mag {ref_mag})"
    print("KERNEL_OK")
</pallas_src>

<mosaic_0001>
module attributes {stable_mosaic.version = 11 : i64} {
  func.func @fused_gnn_kernel(%arg0: i32, %arg1: memref<3xf32, #tpu.memory_space<smem>>, %arg2: memref<128x128xf32, #tpu.memory_space<any>>, %arg3: memref<128x128xbf16, #tpu.memory_space<vmem>>, %arg4: memref<128x128xbf16, #tpu.memory_space<vmem>>, %arg5: memref<128x128xbf16, #tpu.memory_space<vmem>>, %arg6: memref<128x128xbf16, #tpu.memory_space<vmem>>, %arg7: memref<1x128x128xbf16, #tpu.memory_space<vmem>>, %arg8: memref<1x128x128xbf16, #tpu.memory_space<vmem>>, %arg9: memref<1x1x128xf32, #tpu.memory_space<vmem>>, %arg10: memref<1x128x128xbf16, #tpu.memory_space<vmem>>, %arg11: memref<1x1x128xf32, #tpu.memory_space<vmem>>, %arg12: memref<1x128x128xbf16, #tpu.memory_space<vmem>>, %arg13: memref<1x1x128xf32, #tpu.memory_space<vmem>>, %arg14: memref<1x128x128xbf16, #tpu.memory_space<vmem>>, %arg15: memref<1x1x128xf32, #tpu.memory_space<vmem>>, %arg16: memref<128x128xf32, #tpu.memory_space<vmem>>, %arg17: memref<1x128xf32, #tpu.memory_space<vmem>>, %arg18: memref<128x128xf32, #tpu.memory_space<vmem>>, %arg19: memref<128x128xf32, #tpu.memory_space<vmem>>, %arg20: memref<128x128xf32, #tpu.memory_space<vmem>>) attributes {dimension_semantics = [#tpu.dimension_semantics<arbitrary>], iteration_bounds = array<i64: 3>, scalar_prefetch = 1 : i64, scratch_operands = 2 : i64, tpu.core_type = #tpu.core_type<tc>, window_params = [{}, {pipeline_mode = #tpu.pipeline_mode<synchronous>, transform_indices = @transform_1, window_bounds = array<i64: 128, 128>}, {pipeline_mode = #tpu.pipeline_mode<synchronous>, transform_indices = @transform_2, window_bounds = array<i64: 128, 128>}, {pipeline_mode = #tpu.pipeline_mode<synchronous>, transform_indices = @transform_3, window_bounds = array<i64: 128, 128>}, {pipeline_mode = #tpu.pipeline_mode<synchronous>, transform_indices = @transform_4, window_bounds = array<i64: 128, 128>}, {transform_indices = @transform_5, window_bounds = array<i64: 1, 128, 128>}, {transform_indices = @transform_6, window_bounds = array<i64: 1, 128, 128>}, {transform_indices = @transform_7, window_bounds = array<i64: 1, 1, 128>}, {transform_indices = @transform_8, window_bounds = array<i64: 1, 128, 128>}, {transform_indices = @transform_9, window_bounds = array<i64: 1, 1, 128>}, {transform_indices = @transform_10, window_bounds = array<i64: 1, 128, 128>}, {transform_indices = @transform_11, window_bounds = array<i64: 1, 1, 128>}, {transform_indices = @transform_12, window_bounds = array<i64: 1, 128, 128>}, {transform_indices = @transform_13, window_bounds = array<i64: 1, 1, 128>}, {pipeline_mode = #tpu.pipeline_mode<synchronous>, transform_indices = @transform_14, window_bounds = array<i64: 128, 128>}, {pipeline_mode = #tpu.pipeline_mode<synchronous>, transform_indices = @transform_15, window_bounds = array<i64: 1, 128>}, {pipeline_mode = #tpu.pipeline_mode<synchronous>, transform_indices = @transform_16, window_bounds = array<i64: 128, 128>}]} {
    %c0_i32 = arith.constant 0 : i32
    %0 = arith.cmpi eq, %arg0, %c0_i32 : i32
    %1 = arith.extui %0 : i1 to i32
    %c0_i32_0 = arith.constant 0 : i32
    %2 = arith.cmpi ne, %1, %c0_i32_0 : i32
    scf.if %2 {
      "tpu.region"() ({
        %53 = tpu.sem_alloc : memref<!tpu.dma_semaphore, #tpu.memory_space<semaphore_mem>>
        tpu.enqueue_dma source(%arg2 : memref<128x128xf32, #tpu.memory_space<any>>) target(%arg19 : memref<128x128xf32, #tpu.memory_space<vmem>>) target_semaphore(%53 : memref<!tpu.dma_semaphore, #tpu.memory_space<semaphore_mem>>)
        tpu.wait_dma2 semaphore(%53 : memref<!tpu.dma_semaphore, #tpu.memory_space<semaphore_mem>>) src(%arg2 : memref<128x128xf32, #tpu.memory_space<any>>) dst(%arg19 : memref<128x128xf32, #tpu.memory_space<vmem>>)
        tpu.yield
      }) : () -> ()
      %cst_35 = arith.constant 0.000000e+00 : f32
      %51 = vector.broadcast %cst_35 : f32 to vector<128x128xf32>
      %c0_36 = arith.constant 0 : index
      %c0_37 = arith.constant 0 : index
      %52 = vector.load %arg20[%c0_36, %c0_37] : memref<128x128xf32, #tpu.memory_space<vmem>>, vector<128x128xf32>
      tpu.vector_store %arg20[%c0_36, %c0_37], %51 {strides = array<i32>} : memref<128x128xf32, #tpu.memory_space<vmem>>, vector<128x128xf32>,
    } else {
    }
    %c0 = arith.constant 0 : index
    %c0_1 = arith.constant 0 : index
    %3 = vector.load %arg20[%c0, %c0_1] : memref<128x128xf32, #tpu.memory_space<vmem>>, vector<128x128xf32>
    %c0_2 = arith.constant 0 : index
    %c0_3 = arith.constant 0 : index
    %4 = vector.load %arg19[%c0_2, %c0_3] : memref<128x128xf32, #tpu.memory_space<vmem>>, vector<128x128xf32>
    %c0_4 = arith.constant 0 : index
    %c0_5 = arith.constant 0 : index
    %5 = vector.load %arg5[%c0_4, %c0_5] : memref<128x128xbf16, #tpu.memory_space<vmem>>, vector<128x128xbf16>
    %6 = arith.truncf %3 : vector<128x128xf32> to vector<128x128xbf16>
    %cst = arith.constant dense<0.000000e+00> : vector<128x128xf32>
    %7 = tpu.matmul %5, %6, %cst {dimension_numbers = #tpu.dot_dimension_numbers<[1], [0], [0], [1], [0, 0, 1, 1], [], []>} : vector<128x128xbf16>, vector<128x128xbf16>, vector<128x128xf32> -> vector<128x128xf32>
    %8 = arith.addf %4, %7 : vector<128x128xf32>
    %9 = arith.truncf %8 : vector<128x128xf32> to vector<128x128xbf16>
    %c0_6 = arith.constant 0 : index
    %c0_7 = arith.constant 0 : index
    %10 = vector.load %arg3[%c0_6, %c0_7] : memref<128x128xbf16, #tpu.memory_space<vmem>>, vector<128x128xbf16>
    %cst_8 = arith.constant dense<0.000000e+00> : vector<128x128xf32>
    %11 = tpu.matmul %10, %9, %cst_8 {dimension_numbers = #tpu.dot_dimension_numbers<[1], [0], [0], [1], [0, 0, 1, 1], [], []>} : vector<128x128xbf16>, vector<128x128xbf16>, vector<128x128xf32> -> vector<128x128xf32>
    %c0_9 = arith.constant 0 : index
    %c0_10 = arith.constant 0 : index
    %c0_11 = arith.constant 0 : index
    %12 = vector.load %arg7[%c0_9, %c0_10, %c0_11] : memref<1x128x128xbf16, #tpu.memory_space<vmem>>, vector<1x128x128xbf16>
    %13 = vector.shape_cast %12 : vector<1x128x128xbf16> to vector<128x128xbf16>
    %14 = arith.extf %13 : vector<128x128xbf16> to vector<128x128xf32>
    %15 = arith.addf %11, %14 : vector<128x128xf32>
    %cst_12 = arith.constant 0.000000e+00 : f32
    %16 = vector.broadcast %cst_12 : f32 to vector<128x128xf32>
    %17 = arith.maximumf %15, %16 : vector<128x128xf32>
    %c0_13 = arith.constant 0 : index
    %c0_14 = arith.constant 0 : index
    %18 = vector.load %arg4[%c0_13, %c0_14] : memref<128x128xbf16, #tpu.memory_space<vmem>>, vector<128x128xbf16>
    %19 = arith.truncf %17 : vector<128x128xf32> to vector<128x128xbf16>
    %cst_15 = arith.constant dense<0.000000e+00> : vector<128x128xf32>
    %20 = tpu.matmul %18, %19, %cst_15 {dimension_numbers = #tpu.dot_dimension_numbers<[1], [0], [0], [1], [0, 0, 1, 1], [], []>} : vector<128x128xbf16>, vector<128x128xbf16>, vector<128x128xf32> -> vector<128x128xf32>
    %21 = arith.index_cast %arg0 : i32 to index
    %22 = memref.load %arg1[%21] : memref<3xf32, #tpu.memory_space<smem>>
    %cst_16 = arith.constant 1.000000e+00 : f32
    %23 = arith.addf %cst_16, %22 : f32
    %24 = vector.broadcast %23 : f32 to vector<128x128xf32>
    %25 = arith.mulf %8, %24 : vector<128x128xf32>
    %26 = arith.addf %25, %20 : vector<128x128xf32>
    %27 = arith.truncf %26 : vector<128x128xf32> to vector<128x128xbf16>
    %c0_17 = arith.constant 0 : index
    %c0_18 = arith.constant 0 : index
    %c0_19 = arith.constant 0 : index
    %28 = vector.load %arg8[%c0_17, %c0_18, %c0_19] : memref<1x128x128xbf16, #tpu.memory_space<vmem>>, vector<1x128x128xbf16>
    %29 = vector.shape_cast %28 : vector<1x128x128xbf16> to vector<128x128xbf16>
    %cst_20 = arith.constant dense<0.000000e+00> : vector<128x128xf32>
    %30 = tpu.matmul %27, %29, %cst_20 {dimension_numbers = #tpu.dot_dimension_numbers<[1], [0], [0], [1], [0, 0, 1, 1], [], []>} : vector<128x128xbf16>, vector<128x128xbf16>, vector<128x128xf32> -> vector<128x128xf32>
    %c0_21 = arith.constant 0 : index
    %c0_22 = arith.constant 0 : index
    %c0_23 = arith.constant 0 : index
    %31 = vector.load %arg9[%c0_21, %c0_22, %c0_23] : memref<1x1x128xf32, #tpu.memory_space<vmem>>, vector<1x1x128xf32>
    %32 = vector.shape_cast %31 : vector<1x1x128xf32> to vector<1x128xf32>
    %33 = vector.broadcast %32 : vector<1x128xf32> to vector<128x128xf32>
    %34 = arith.addf %30, %33 : vector<128x128xf32>
    %cst_24 = arith.constant 0.000000e+00 : f32
    %35 = vector.broadcast %cst_24 : f32 to vector<128x128xf32>
    %36 = arith.maximumf %34, %35 : vector<128x128xf32>
    %37 = arith.truncf %36 : vector<128x128xf32> to vector<128x128xbf16>
    %c0_25 = arith.constant 0 : index
    %c0_26 = arith.constant 0 : index
    %c0_27 = arith.constant 0 : index
    %38 = vector.load %arg10[%c0_25, %c0_26, %c0_27] : memref<1x128x128xbf16, #tpu.memory_space<vmem>>, vector<1x128x128xbf16>
    %39 = vector.shape_cast %38 : vector<1x128x128xbf16> to vector<128x128xbf16>
    %cst_28 = arith.constant dense<0.000000e+00> : vector<128x128xf32>
    %40 = tpu.matmul %37, %39, %cst_28 {dimension_numbers = #tpu.dot_dimension_numbers<[1], [0], [0], [1], [0, 0, 1, 1], [], []>} : vector<128x128xbf16>, vector<128x128xbf16>, vector<128x128xf32> -> vector<128x128xf32>
    %c0_29 = arith.constant 0 : index
    %c0_30 = arith.constant 0 : index
    %c0_31 = arith.constant 0 : index
    %41 = vector.load %arg11[%c0_29, %c0_30, %c0_31] : memref<1x1x128xf32, #tpu.memory_space<vmem>>, vector<1x1x128xf32>
    %42 = vector.shape_cast %41 : vector<1x1x128xf32> to vector<1x128xf32>
    %43 = vector.broadcast %42 : vector<1x128xf32> to vector<128x128xf32>
    %44 = arith.addf %40, %43 : vector<128x128xf32>
    %c2_i32 = arith.constant 2 : i32
    %45 = arith.cmpi slt, %arg0, %c2_i32 : i32
    %46 = arith.extui %45 : i1 to i32
    %c0_i32_32 = arith.constant 0 : i32
    %47 = arith.cmpi ne, %46, %c0_i32_32 : i32
    scf.if %47 {
      %cst_35 = arith.constant 0.000000e+00 : f32
      %51 = vector.broadcast %cst_35 : f32 to vector<128x128xf32>
      %52 = arith.maximumf %44, %51 : vector<128x128xf32>
      %c0_36 = arith.constant 0 : index
      %c0_37 = arith.constant 0 : index
      %53 = vector.load %arg19[%c0_36, %c0_37] : memref<128x128xf32, #tpu.memory_space<vmem>>, vector<128x128xf32>
      tpu.vector_store %arg19[%c0_36, %c0_37], %52 {strides = array<i32>} : memref<128x128xf32, #tpu.memory_space<vmem>>, vector<128x128xf32>,
      %c0_38 = arith.constant 0 : index
      %c0_39 = arith.constant 0 : index
      %54 = vector.load %arg6[%c0_38, %c0_39] : memref<128x128xbf16, #tpu.memory_space<vmem>>, vector<128x128xbf16>
      %cst_40 = arith.constant dense<0.000000e+00> : vector<128x128xf32>
      %55 = tpu.matmul %54, %9, %cst_40 {dimension_numbers = #tpu.dot_dimension_numbers<[1], [0], [0], [1], [0, 0, 1, 1], [], []>} : vector<128x128xbf16>, vector<128x128xbf16>, vector<128x128xf32> -> vector<128x128xf32>
      %56 = arith.addf %55, %3 : vector<128x128xf32>
      %57 = arith.truncf %56 : vector<128x128xf32> to vector<128x128xbf16>
      %c0_41 = arith.constant 0 : index
      %c0_42 = arith.constant 0 : index
      %c0_43 = arith.constant 0 : index
      %58 = vector.load %arg12[%c0_41, %c0_42, %c0_43] : memref<1x128x128xbf16, #tpu.memory_space<vmem>>, vector<1x128x128xbf16>
      %59 = vector.shape_cast %58 : vector<1x128x128xbf16> to vector<128x128xbf16>
      %cst_44 = arith.constant dense<0.000000e+00> : vector<128x128xf32>
      %60 = tpu.matmul %57, %59, %cst_44 {dimension_numbers = #tpu.dot_dimension_numbers<[1], [0], [0], [1], [0, 0, 1, 1], [], []>} : vector<128x128xbf16>, vector<128x128xbf16>, vector<128x128xf32> -> vector<128x128xf32>
      %c0_45 = arith.constant 0 : index
      %c0_46 = arith.constant 0 : index
      %c0_47 = arith.constant 0 : index
      %61 = vector.load %arg13[%c0_45, %c0_46, %c0_47] : memref<1x1x128xf32, #tpu.memory_space<vmem>>, vector<1x1x128xf32>
      %62 = vector.shape_cast %61 : vector<1x1x128xf32> to vector<1x128xf32>
      %63 = vector.broadcast %62 : vector<1x128xf32> to vector<128x128xf32>
      %64 = arith.addf %60, %63 : vector<128x128xf32>
      %cst_48 = arith.constant 0.000000e+00 : f32
      %65 = vector.broadcast %cst_48 : f32 to vector<128x128xf32>
      %66 = arith.maximumf %64, %65 : vector<128x128xf32>
      %67 = arith.truncf %66 : vector<128x128xf32> to vector<128x128xbf16>
      %c0_49 = arith.constant 0 : index
      %c0_50 = arith.constant 0 : index
      %c0_51 = arith.constant 0 : index
      %68 = vector.load %arg14[%c0_49, %c0_50, %c0_51] : memref<1x128x128xbf16, #tpu.memory_space<vmem>>, vector<1x128x128xbf16>
      %69 = vector.shape_cast %68 : vector<1x128x128xbf16> to vector<128x128xbf16>
      %cst_52 = arith.constant dense<0.000000e+00> : vector<128x128xf32>
      %70 = tpu.matmul %67, %69, %cst_52 {dimension_numbers = #tpu.dot_dimension_numbers<[1], [0], [0], [1], [0, 0, 1, 1], [], []>} : vector<128x128xbf16>, vector<128x128xbf16>, vector<128x128xf32> -> vector<128x128xf32>
      %c0_53 = arith.constant 0 : index
      %c0_54 = arith.constant 0 : index
      %c0_55 = arith.constant 0 : index
      %71 = vector.load %arg15[%c0_53, %c0_54, %c0_55] : memref<1x1x128xf32, #tpu.memory_space<vmem>>, vector<1x1x128xf32>
      %72 = vector.shape_cast %71 : vector<1x1x128xf32> to vector<1x128xf32>
      %73 = vector.broadcast %72 : vector<1x128xf32> to vector<128x128xf32>
      %74 = arith.addf %70, %73 : vector<128x128xf32>
      %cst_56 = arith.constant 0.000000e+00 : f32
      %75 = vector.broadcast %cst_56 : f32 to vector<128x128xf32>
      %76 = arith.maximumf %74, %75 : vector<128x128xf32>
      %c0_57 = arith.constant 0 : index
      %c0_58 = arith.constant 0 : index
      %77 = vector.load %arg20[%c0_57, %c0_58] : memref<128x128xf32, #tpu.memory_space<vmem>>, vector<128x128xf32>
      tpu.vector_store %arg20[%c0_57, %c0_58], %76 {strides = array<i32>} : memref<128x128xf32, #tpu.memory_space<vmem>>, vector<128x128xf32>,
    } else {
    }
    %c2_i32_33 = arith.constant 2 : i32
    %48 = arith.cmpi eq, %arg0, %c2_i32_33 : i32
    %49 = arith.extui %48 : i1 to i32
    %c0_i32_34 = arith.constant 0 : i32
    %50 = arith.cmpi ne, %49, %c0_i32_34 : i32
    scf.if %50 {
      %c0_35 = arith.constant 0 : index
      %c0_36 = arith.constant 0 : index
      %51 = vector.load %arg6[%c0_35, %c0_36] : memref<128x128xbf16, #tpu.memory_space<vmem>>, vector<128x128xbf16>
      %52 = arith.truncf %44 : vector<128x128xf32> to vector<128x128xbf16>
      %cst_37 = arith.constant dense<0.000000e+00> : vector<128x128xf32>
      %53 = tpu.matmul %51, %52, %cst_37 {dimension_numbers = #tpu.dot_dimension_numbers<[1], [0], [0], [1], [0, 0, 1, 1], [], []>} : vector<128x128xbf16>, vector<128x128xbf16>, vector<128x128xf32> -> vector<128x128xf32>
      %c0_38 = arith.constant 0 : index
      %c0_39 = arith.constant 0 : index
      %54 = vector.load %arg16[%c0_38, %c0_39] : memref<128x128xf32, #tpu.memory_space<vmem>>, vector<128x128xf32>
      %cst_40 = arith.constant dense<0.000000e+00> : vector<128x128xf32>
      %55 = tpu.matmul %53, %54, %cst_40 {dimension_numbers = #tpu.dot_dimension_numbers<[1], [0], [0], [1], [0, 0, 1, 1], [], []>} : vector<128x128xf32>, vector<128x128xf32>, vector<128x128xf32> -> vector<128x128xf32>
      %c0_41 = arith.constant 0 : index
      %c0_42 = arith.constant 0 : index
      %56 = vector.load %arg17[%c0_41, %c0_42] : memref<1x128xf32, #tpu.memory_space<vmem>>, vector<1x128xf32>
      %57 = vector.broadcast %56 : vector<1x128xf32> to vector<128x128xf32>
      %58 = arith.addf %55, %57 : vector<128x128xf32>
      %cst_43 = arith.constant 0.000000e+00 : f32
      %cst_44 = arith.constant 5.000000e+01 : f32
      %59 = vector.broadcast %cst_43 : f32 to vector<128x128xf32>
      %60 = arith.maximumf %59, %58 : vector<128x128xf32>
      %61 = vector.broadcast %cst_44 : f32 to vector<128x128xf32>
      %62 = arith.minimumf %61, %60 : vector<128x128xf32>
      %c0_45 = arith.constant 0 : index
      %c0_46 = arith.constant 0 : index
      %63 = vector.load %arg18[%c0_45, %c0_46] : memref<128x128xf32, #tpu.memory_space<vmem>>, vector<128x128xf32>
      tpu.vector_store %arg18[%c0_45, %c0_46], %62 {strides = array<i32>} : memref<128x128xf32, #tpu.memory_space<vmem>>, vector<128x128xf32>,
    } else {
    }
    return
  }
  func.func @transform_1(%arg0: i32, %arg1: memref<3xf32, #tpu.memory_space<smem>>) -> (i32, i32) {
    %c0_i32 = arith.constant 0 : i32
    %c0_i32_0 = arith.constant 0 : i32
    %c0_i32_1 = arith.constant 0 : i32
    return %c0_i32, %c0_i32_0 : i32, i32
  }
  func.func @transform_2(%arg0: i32, %arg1: memref<3xf32, #tpu.memory_space<smem>>) -> (i32, i32) {
    %c0_i32 = arith.constant 0 : i32
    %c0_i32_0 = arith.constant 0 : i32
    %c0_i32_1 = arith.constant 0 : i32
    return %c0_i32, %c0_i32_0 : i32, i32
  }
  func.func @transform_3(%arg0: i32, %arg1: memref<3xf32, #tpu.memory_space<smem>>) -> (i32, i32) {
    %c0_i32 = arith.constant 0 : i32
    %c0_i32_0 = arith.constant 0 : i32
    %c0_i32_1 = arith.constant 0 : i32
    return %c0_i32, %c0_i32_0 : i32, i32
  }
  func.func @transform_4(%arg0: i32, %arg1: memref<3xf32, #tpu.memory_space<smem>>) -> (i32, i32) {
    %c0_i32 = arith.constant 0 : i32
    %c0_i32_0 = arith.constant 0 : i32
    %c0_i32_1 = arith.constant 0 : i32
    return %c0_i32, %c0_i32_0 : i32, i32
  }
  func.func @transform_5(%arg0: i32, %arg1: memref<3xf32, #tpu.memory_space<smem>>) -> (i32, i32, i32) {
    %c0_i32 = arith.constant 0 : i32
    %c0_i32_0 = arith.constant 0 : i32
    %c0_i32_1 = arith.constant 0 : i32
    return %arg0, %c0_i32, %c0_i32_0 : i32, i32, i32
  }
  func.func @transform_6(%arg0: i32, %arg1: memref<3xf32, #tpu.memory_space<smem>>) -> (i32, i32, i32) {
    %c0_i32 = arith.constant 0 : i32
    %c0_i32_0 = arith.constant 0 : i32
    %c0_i32_1 = arith.constant 0 : i32
    return %arg0, %c0_i32, %c0_i32_0 : i32, i32, i32
  }
  func.func @transform_7(%arg0: i32, %arg1: memref<3xf32, #tpu.memory_space<smem>>) -> (i32, i32, i32) {
    %c0_i32 = arith.constant 0 : i32
    %c0_i32_0 = arith.constant 0 : i32
    %c0_i32_1 = arith.constant 0 : i32
    return %arg0, %c0_i32, %c0_i32_0 : i32, i32, i32
  }
  func.func @transform_8(%arg0: i32, %arg1: memref<3xf32, #tpu.memory_space<smem>>) -> (i32, i32, i32) {
    %c0_i32 = arith.constant 0 : i32
    %c0_i32_0 = arith.constant 0 : i32
    %c0_i32_1 = arith.constant 0 : i32
    return %arg0, %c0_i32, %c0_i32_0 : i32, i32, i32
  }
  func.func @transform_9(%arg0: i32, %arg1: memref<3xf32, #tpu.memory_space<smem>>) -> (i32, i32, i32) {
    %c0_i32 = arith.constant 0 : i32
    %c0_i32_0 = arith.constant 0 : i32
    %c0_i32_1 = arith.constant 0 : i32
    return %arg0, %c0_i32, %c0_i32_0 : i32, i32, i32
  }
  func.func @transform_10(%arg0: i32, %arg1: memref<3xf32, #tpu.memory_space<smem>>) -> (i32, i32, i32) {
    %c0_i32 = arith.constant 0 : i32
    %c0_i32_0 = arith.constant 0 : i32
    %c0_i32_1 = arith.constant 0 : i32
    return %arg0, %c0_i32, %c0_i32_0 : i32, i32, i32
  }
  func.func @transform_11(%arg0: i32, %arg1: memref<3xf32, #tpu.memory_space<smem>>) -> (i32, i32, i32) {
    %c0_i32 = arith.constant 0 : i32
    %c0_i32_0 = arith.constant 0 : i32
    %c0_i32_1 = arith.constant 0 : i32
    return %arg0, %c0_i32, %c0_i32_0 : i32, i32, i32
  }
  func.func @transform_12(%arg0: i32, %arg1: memref<3xf32, #tpu.memory_space<smem>>) -> (i32, i32, i32) {
    %c0_i32 = arith.constant 0 : i32
    %c0_i32_0 = arith.constant 0 : i32
    %c0_i32_1 = arith.constant 0 : i32
    return %arg0, %c0_i32, %c0_i32_0 : i32, i32, i32
  }
  func.func @transform_13(%arg0: i32, %arg1: memref<3xf32, #tpu.memory_space<smem>>) -> (i32, i32, i32) {
    %c0_i32 = arith.constant 0 : i32
    %c0_i32_0 = arith.constant 0 : i32
    %c0_i32_1 = arith.constant 0 : i32
    return %arg0, %c0_i32, %c0_i32_0 : i32, i32, i32
  }
  func.func @transform_14(%arg0: i32, %arg1: memref<3xf32, #tpu.memory_space<smem>>) -> (i32, i32) {
    %c0_i32 = arith.constant 0 : i32
    %c0_i32_0 = arith.constant 0 : i32
    %c0_i32_1 = arith.constant 0 : i32
    return %c0_i32, %c0_i32_0 : i32, i32
  }
  func.func @transform_15(%arg0: i32, %arg1: memref<3xf32, #tpu.memory_space<smem>>) -> (i32, i32) {
    %c0_i32 = arith.constant 0 : i32
    %c0_i32_0 = arith.constant 0 : i32
    %c0_i32_1 = arith.constant 0 : i32
    return %c0_i32, %c0_i32_0 : i32, i32
  }
  func.func @transform_16(%arg0: i32, %arg1: memref<3xf32, #tpu.memory_space<smem>>) -> (i32, i32) {
    %c0_i32 = arith.constant 0 : i32
    %c0_i32_0 = arith.constant 0 : i32
    %c0_i32_1 = arith.constant 0 : i32
    return %c0_i32, %c0_i32_0 : i32, i32
  }
}

</mosaic_0001>

<bundles_post_ra>
// kernel: tpu_custom_call.1
= control target key start
LH: loop header
LB: loop body
LE: loop exit
PB: predicated region body
PF: predicated region fallthrough
CT: control target
= control target key end

     0   :  { %s5328_s0 = inlined_call_operand.hbm [shape: f32[3], index: 0, kind: input, shape index: {}]   ;;  %s5329_s1 = inlined_call_operand.hbm [shape: f32[128,128], index: 1, kind: input, shape index: {}]   ;;  %s5330_s2 = inlined_call_operand.hbm [shape: bf16[128,128], index: 2, kind: input, shape index: {}]   ;;  %s5331_s3 = inlined_call_operand.hbm [shape: bf16[128,128], index: 3, kind: input, shape index: {}]   ;;  %s5332_s4 = inlined_call_operand.hbm [shape: bf16[128,128], index: 4, kind: input, shape index: {}]   ;;  %s5333_s5 = inlined_call_operand.hbm [shape: bf16[128,128], index: 5, kind: input, shape index: {}]   ;;  %s5334_s6 = inlined_call_operand.hbm [shape: bf16[3,128,128], index: 6, kind: input, shape index: {}]   ;;  %s5335_s7 = inlined_call_operand.hbm [shape: bf16[3,128,128], index: 7, kind: input, shape index: {}]   ;;  %s5336_s8 = inlined_call_operand.vmem [shape: f32[3,1,128], index: 8, kind: input, shape index: {}]   ;;  %s5337_s9 = inlined_call_operand.hbm [shape: bf16[3,128,128], index: 9, kind: input, shape index: {}]   ;;  %s5338_s10 = inlined_call_operand.vmem [shape: f32[3,1,128], index: 10, kind: input, shape index: {}]   ;;  %s5339_s11 = inlined_call_operand.hbm [shape: bf16[3,128,128], index: 11, kind: input, shape index: {}]   ;;  %s5340_s12 = inlined_call_operand.vmem [shape: f32[3,1,128], index: 12, kind: input, shape index: {}]   ;;  %s5341_s13 = inlined_call_operand.hbm [shape: bf16[3,128,128], index: 13, kind: input, shape index: {}]   ;;  %s5342_s14 = inlined_call_operand.vmem [shape: f32[3,1,128], index: 14, kind: input, shape index: {}]   ;;  %s5343_s15 = inlined_call_operand.hbm [shape: f32[128,128], index: 15, kind: input, shape index: {}]   ;;  %s5344_s16 = inlined_call_operand.vmem [shape: f32[1,128], index: 16, kind: input, shape index: {}]   ;;  %s5345_s17 = inlined_call_operand.hbm [shape: f32[128,128], index: 17, kind: output, shape index: {}]  }
   0x1   :  { %5375 = sst [smem:[#allocation41_spill]] %s5328_s0 }
   0x2   :  { %5376 = sst [smem:[#allocation42_spill]] %s5329_s1  ;;  %s5387_s26 = sld [smem:[#allocation41_spill]] }
   0x3   :  { %5377 = sst [smem:[#allocation43_spill]] %s5330_s2 }
   0x4   :  { %5378 = sst [smem:[#allocation44_spill]] %s5331_s3 }
   0x5   :  { %5379 = sst [smem:[#allocation45_spill]] %s5332_s4 }
   0x6   :  { %5380 = sst [smem:[#allocation46_spill]] %s5334_s6 }
   0x7   :  { %5381 = sst [smem:[#allocation47_spill]] %s5336_s8 }
   0x8   :  { %5382 = sst [smem:[#allocation48_spill]] %s5338_s10  ;;  %s3974_s10 = scalar_lea.hbm %s5387_s26, 16 }
   0x9   :  { %5383 = sst [smem:[#allocation49_spill]] %s5340_s12  ;;  %p3975_p0 = scmp.ne.s32.totalorder %s5387_s26, %s3974_s10 }
   0xa   :  { %5384 = sst [smem:[#allocation50_spill]] %s5342_s14  ;;  %p3978_p1 = scmp.lt.u32.totalorder %s3974_s10, %s5387_s26 }
   0xb   :  { %5385 = sst [smem:[#allocation51_spill]] %s5344_s16 }
   0xc   :  { %5386 = sst [smem:[#allocation52_spill]] %s5345_s17  ;;  %p3980_p2 = pnand %p3978_p1, %p3975_p0 }
   0xe   :  { %3983 = shalt.err (!%p3980_p2)  }
   0xf   :  { %s4382_s30 = smov [#allocation5]  }
  0x10   :  { %23 = dma.hbm_to_smem %s5387_s26, 16, %s4382_s30, [#allocation4] }
  0x11   :  { %4338 = dma.done.wait [#allocation4], 16 }
  0x12   :  { %4339 = vsyncadd [#allocation4], 4294967280 }
  0x13   :  { %25 = sfence }
  0x14   :  { %26 = vsyncpa [#allocation7], 0 }
  0x15   :  { %27 = vsyncpa [#allocation10], 0 }
  0x16   :  { %28 = vsyncpa [#allocation13], 0 }
  0x17   :  { %29 = vsyncpa [#allocation8], 0  ;;  %s4504_s1 = smov 0   ;;  %s4506_s20 = smov 0  }
  0x18   :  { %s4508_s21 = smov 0   ;;  %s4510_s10 = smov 0  }
  0x19 LB: > { %5388 = sst [smem:[#allocation34_spill]] %s4372_s20  ;;  %s4523_s22 = sadd.s32 4294967295, %s4380_s10   ;;  %s4380_s10 = sphi %s4510_s10, %s5445_s10   ;;  %s4376_s21 = sphi %s4508_s21, %s5448_s21   ;;  %s4372_s20 = sphi %s4506_s20, %s5447_s20   ;;  %s4368_s1 = sphi %s4504_s1, %s5446_s1  }
  0x1a   : > { %5389 = sst [smem:[#allocation35_spill]] %s4376_s21  ;;  %p139_p3 = scmp.ne.s32.totalorder %s4372_s20, %s4368_s1 }
  0x1b   : > { %5390 = sst [smem:[#allocation36_spill]] %s4523_s22  ;;  %p5349_p4 = scmp.eq.s32.totalorder %s4523_s22, 0 }
  0x1c   : > { %p3031_p5 = scmp.ge.s32.totalorder %s4380_s10, 1  ;;  %p421_p6 = scmp.lt.s32.totalorder %s4380_s10, 4 }
  0x1d   : > { %p4532_p8 = por %p5349_p4, %p139_p3  ;;  %s4383_s25 = smov [#allocation6]  }
  0x1e   : > { %p4536_p9 = pnand %p3031_p5, %p421_p6  ;;  %s433_s26 = sshll.u32 %s4383_s25, 4  ;;  %s434_s26 = int_to_ptr.vmem [resolvable:$true] %s433_s26 }
  0x1f   : > { %s5391_s23 = scalar_select %p4532_p8, 1, 0 }
  0x20   : > { %s5393_s24 = scalar_select %p4536_p9, 1, 0 }
  0x21   : > { %5392 = sst [smem:[#allocation37_spill]] %s5391_s23  ;;  %p3810_p10 = pneg %p4536_p9 }
  0x22   : > { %s4549_s28 = sadd.s32 1, %s4380_s10   ;;  %s126_s29 = sadd.s32 1, %s4376_s21 }
  0x23   : > { %p4544_p11 = pnand %p3810_p10, %p5349_p4  ;;  %5395 = sst [smem:[#allocation38_spill]] %s4549_s28 }
  0x24   : > { %s123_s0 = ssub.s32 %s4380_s10, %s4549_s28  ;;  %s5396_s2 = sld [smem:[#allocation43_spill]] }
  0x25   : > { %s5394_s27 = scalar_select %p4544_p11, 1, 0 }
  0x26   : > { %p4562_p13 = pneg %p4544_p11 }
  0x28   : > { %s5397_s17 = scalar_select %p4562_p13, 1, 0 }
  0x2a   : > { %s3984_s19 = scalar_lea.hbm %s5396_s2, 1024 }
  0x2b   : > { %p3985_p12 = scmp.ne.s32.totalorder %s5396_s2, %s3984_s19  ;;  %p3991_p2 = scmp.lt.u32.totalorder %s3984_s19, %s5396_s2 }
  0x2d   : > { %p3987_p0 = pnand %p4562_p13, %p3985_p12 }
  0x2f   : > { %p3988_p1 = pneg %p3987_p0 }
  0x31   : > { %p3993_p3 = pnand %p3991_p2, %p3988_p1 }
  0x33   : > { %3996 = shalt.err (!%p3993_p3)
}
  0x34   : > { %s3997_s30 = scalar_lea.vmem %s434_s26, 1024  ;;  %p4005_p7 = scmp.lt.s32.totalorder %s434_s26, %s434_s26 }
  0x35   : > { %p3998_p5 = scmp.ne.s32.totalorder %s434_s26, %s3997_s30  ;;  %p4006_p4 = scmp.lt.s32.totalorder %s3997_s30, %s3997_s30 }
  0x37   : > { %p4000_p6 = pnand %p3998_p5, %p4562_p13  ;;  %p4007_p8 = por %p4006_p4, %p4005_p7 }
  0x39   : > { %p4001_p10 = pneg %p4000_p6 }
  0x3b   : > { %p4008_p9 = pnand %p4007_p8, %p4001_p10 }
  0x3d   : > { %4011 = shalt.err (!%p4008_p9)
}
  0x3e   : > { %s5356_s18 = smov 64   ;;  %s5358_s14 = smov 4  }
  0x3f   : > { %3813 = dma.hbm_to_vmem [thread:$0]  (!%p4544_p11), %s5396_s2, 1024, %s434_s26, [#allocation7], %s5356_s18, %s5356_s18, %s5358_s14  }
  0x40   : > { %p124_p4 = scmp.eq.s32.totalorder %s123_s0, 0  ;;  %p133_p7 = scmp.ne.s32.totalorder %s4376_s21, %s4372_s20 }
  0x41   : > { %p134_p8 = scmp.eq.s32.totalorder %s4380_s10, 0  ;;  %p3847_p9 = scmp.lt.s32.totalorder %s4380_s10, 3 }
  0x42   : > { %s4586_s1 = scalar_select %p124_p4, %s4376_s21, %s126_s29  }
  0x43   : > { %p135_p12 = por %p134_p8, %p133_p7  ;;  %s502_s25 = sand.u32 1, %s4380_s10  }
  0x44   : > { %5398 = sst [smem:[#allocation39_spill]] %s4586_s1  ;;  %s504_s30 = sand.u32 1, %s4376_s21  }
  0x45   : > { %s4590_s28 = sshll.u32 %s504_s30, 6  ;;  %s4593_s12 = sshll.u32 %s4380_s10, 10 }
  0x46   : > { %s5399_s6 = sld [smem:[#allocation46_spill]]  ;;  %s506_s29 = scalar_lea.vmem [#allocation14], %s4590_s28 }
  0x47   : > { %s513_s0 = sshll.u32 %s506_s29, 4  ;;  %p4602_p0 = pnand %p3847_p9, %p135_p12  ;;  %s4606_s0 = int_to_ptr.vmem [resolvable:$true] %s513_s0 }
  0x48   : > { %s4612_s8 = scalar_lea.hbm %s5335_s7, %s4593_s12  ;;  %s4614_s23 = scalar_lea.sflag [#allocation7], %s502_s25 }
  0x49   : > { %s5400_s16 = scalar_select %p4602_p0, 1, 0 }
  0x4a   : > { %p4620_p2 = pneg %p4602_p0 }
  0x4c   : > { %s4599_s26 = scalar_lea.hbm %s5399_s6, %s4593_s12  ;;  %s4017_s2 = scalar_lea.hbm %s5399_s6, 3072 }
  0x4d   : > { %s4012_s30 = scalar_lea.hbm %s4599_s26, 1024  ;;  %p4018_p6 = scmp.lt.u32.totalorder %s4599_s26, %s5399_s6 }
  0x4e   : > { %p4013_p1 = scmp.ne.s32.totalorder %s4599_s26, %s4012_s30  ;;  %p4019_p10 = scmp.lt.u32.totalorder %s4017_s2, %s4012_s30 }
  0x4f   : > { %s5401_s18 = scalar_select %p4620_p2, 1, 0 }
  0x50   : > { %p4015_p3 = pnand %p4620_p2, %p4013_p1  ;;  %p4020_p4 = por %p4019_p10, %p4018_p6 }
  0x51   : > { %p4021_p7 = scmp.lt.u32.totalorder %s4012_s30, %s4599_s26 }
  0x52   : > { %p4016_p5 = pneg %p4015_p3 }
  0x53   : > { %p4022_p8 = por %p4021_p7, %p4020_p4 }
  0x55   : > { %p4023_p9 = pnand %p4022_p8, %p4016_p5 }
  0x57   : > { %4026 = shalt.err (!%p4023_p9)
}
  0x58   : > { %s4027_s25 = scalar_lea.vmem %s4606_s0, 1024  ;;  %s4386_s14 = smov [#allocation14]  }
  0x59   : > { %p4028_p12 = scmp.ne.s32.totalorder %s4606_s0, %s4027_s25  ;;  %s4032_s29 = sshll.u32 %s4386_s14, 4  ;;  %s4033_s29 = int_to_ptr.vmem [resolvable:$false] %s4032_s29 }
  0x5a   : > { %s4034_s10 = scalar_lea.vmem %s4033_s29, 2048  ;;  %p4035_p11 = scmp.lt.s32.totalorder %s4606_s0, %s4033_s29 }
  0x5b   : > { %p4030_p1 = pnand %p4028_p12, %p4620_p2  ;;  %p4036_p13 = scmp.lt.s32.totalorder %s4034_s10, %s4027_s25 }
  0x5d   : > { %p4031_p3 = pneg %p4030_p1  ;;  %p4037_p6 = por %p4036_p13, %p4035_p11 }
  0x5f   : > { %p4038_p10 = pnand %p4037_p6, %p4031_p3 }
  0x61   : > { %4041 = shalt.err (!%p4038_p10)
}
  0x62   : > { %s5402_s2 = smov 4   ;;  %s5403_s30 = smov 64  }
  0x63   : > { %3829 = dma.hbm_to_vmem [thread:$0]  (!%p4602_p0), %s4599_s26, 1024, %s4606_s0, %s4614_s23, %s5403_s30, %s5403_s30, %s5402_s2  }
  0x64   : > { %s527_s19 = scalar_lea.vmem [#allocation15], %s4590_s28  ;;  %s4387_s14 = smov [#allocation9]  }
  0x65   : > { %s534_s25 = sshll.u32 %s527_s19, 4  ;;  %s4650_s29 = sshll.u32 %s4387_s14, 4  ;;  %s4648_s25 = int_to_ptr.vmem [resolvable:$true] %s534_s25  ;;  %s447_s29 = int_to_ptr.vmem [resolvable:$true] %s4650_s29 }
  0x66   : > { %s4042_s10 = scalar_lea.hbm %s4612_s8, 1024  ;;  %s4047_s21 = scalar_lea.hbm %s5335_s7, 3072 }
  0x67   : > { %p4043_p11 = scmp.ne.s32.totalorder %s4612_s8, %s4042_s10  ;;  %p4048_p4 = scmp.lt.u32.totalorder %s4612_s8, %s5335_s7 }
  0x68   : > { %p4049_p7 = scmp.lt.u32.totalorder %s4047_s21, %s4042_s10  ;;  %p4051_p9 = scmp.lt.u32.totalorder %s4042_s10, %s4612_s8 }
  0x69   : > { %p4045_p13 = pnand %p4043_p11, %p4620_p2 }
  0x6a   : > { %p4050_p8 = por %p4049_p7, %p4048_p4 }
  0x6b   : > { %p4046_p5 = pneg %p4045_p13 }
  0x6c   : > { %p4052_p12 = por %p4051_p9, %p4050_p8 }
  0x6e   : > { %p4053_p1 = pnand %p4052_p12, %p4046_p5 }
  0x70   : > { %4056 = shalt.err (!%p4053_p1)
}
  0x71   : > { %s4057_s26 = scalar_lea.vmem %s4648_s25, 1024  ;;  %s4388_s6 = smov [#allocation15]  }
  0x72   : > { %p4058_p3 = scmp.ne.s32.totalorder %s4648_s25, %s4057_s26  ;;  %s4062_s1 = sshll.u32 %s4388_s6, 4  ;;  %s4063_s1 = int_to_ptr.vmem [resolvable:$false] %s4062_s1 }
  0x73   : > { %s4064_s20 = scalar_lea.vmem %s4063_s1, 2048  ;;  %p4065_p11 = scmp.lt.s32.totalorder %s4648_s25, %s4063_s1 }
  0x74   : > { %p4060_p6 = pnand %p4058_p3, %p4620_p2  ;;  %p4066_p13 = scmp.lt.s32.totalorder %s4064_s20, %s4057_s26 }
  0x76   : > { %p4061_p10 = pneg %p4060_p6  ;;  %p4067_p4 = por %p4066_p13, %p4065_p11 }
  0x78   : > { %p4068_p7 = pnand %p4067_p4, %p4061_p10 }
  0x7a   : > { %4071 = shalt.err (!%p4068_p7)
}
  0x7b   : > { %3832 = dma.hbm_to_vmem [thread:$0]  (!%p4602_p0), %s4612_s8, 1024, %s4648_s25, %s4614_s23, %s5403_s30, %s5403_s30, %s5402_s2  }
  0x7c   : > { %s5404_s3 = sld [smem:[#allocation44_spill]]  ;;  %p5405_p8 = scmp.ne.s32.totalorder %s5397_s17, 0 }
  0x82   : > { %s4072_s0 = scalar_lea.hbm %s5404_s3, 1024 }
  0x83   : > { %p4073_p5 = scmp.ne.s32.totalorder %s5404_s3, %s4072_s0  ;;  %p4079_p1 = scmp.lt.u32.totalorder %s4072_s0, %s5404_s3 }
  0x85   : > { %p4075_p9 = pnand %p4073_p5, %p5405_p8 }
  0x87   : > { %p4076_p12 = pneg %p4075_p9 }
  0x89   : > { %p4081_p3 = pnand %p4079_p1, %p4076_p12 }
  0x8b   : > { %4084 = shalt.err (!%p4081_p3)
}
  0x8c   : > { %s4085_s6 = scalar_lea.vmem %s447_s29, 1024  ;;  %p4093_p13 = scmp.lt.s32.totalorder %s447_s29, %s447_s29 }
  0x8d   : > { %p4086_p6 = scmp.ne.s32.totalorder %s447_s29, %s4085_s6  ;;  %p4094_p4 = scmp.lt.s32.totalorder %s4085_s6, %s4085_s6 }
  0x8f   : > { %p4088_p10 = pnand %p4086_p6, %p5405_p8  ;;  %p4095_p7 = por %p4094_p4, %p4093_p13 }
  0x91   : > { %p4089_p11 = pneg %p4088_p10 }
  0x93   : > { %p4096_p0 = pnand %p4095_p7, %p4089_p11 }
  0x95   : > { %4099 = shalt.err (!%p4096_p0)
}
  0x96   : > { %p5406_p5 = scmp.ne.s32.totalorder %s5394_s27, 0  ;;  %s4703_s21 = scalar_lea.hbm %s5337_s9, %s4593_s12 }
  0x97   : > { %s554_s22 = scalar_lea.vmem [#allocation16], %s4590_s28  ;;  %s4100_s19 = scalar_lea.hbm %s4703_s21, 1024 }
  0x98   : > { %3816 = dma.hbm_to_vmem [thread:$0]  (!%p5406_p5), %s5404_s3, 1024, %s447_s29, [#allocation10], %s5403_s30, %s5403_s30, %s5402_s2  }
  0x99   : > { %s561_s0 = sshll.u32 %s554_s22, 4  ;;  %p4101_p0 = scmp.ne.s32.totalorder %s4703_s21, %s4100_s19  ;;  %s4706_s0 = int_to_ptr.vmem [resolvable:$true] %s561_s0 }
  0x9a   : > { %s4105_s10 = scalar_lea.hbm %s5337_s9, 3072  ;;  %p4106_p1 = scmp.lt.u32.totalorder %s4703_s21, %s5337_s9 }
  0x9b   : > { %p4103_p9 = pnand %p4101_p0, %p4620_p2  ;;  %p4107_p3 = scmp.lt.u32.totalorder %s4105_s10, %s4100_s19 }
  0x9c   : > { %p4109_p10 = scmp.lt.u32.totalorder %s4100_s19, %s4703_s21 }
  0x9d   : > { %p4104_p12 = pneg %p4103_p9  ;;  %p4108_p6 = por %p4107_p3, %p4106_p1 }
  0x9f   : > { %p4110_p11 = por %p4109_p10, %p4108_p6 }
  0xa1   : > { %p4111_p13 = pnand %p4110_p11, %p4104_p12 }
  0xa3   : > { %4114 = shalt.err (!%p4111_p13)
}
  0xa4   : > { %s4115_s8 = scalar_lea.vmem %s4706_s0, 1024  ;;  %s4389_s25 = smov [#allocation16]  }
  0xa5   : > { %p4116_p4 = scmp.ne.s32.totalorder %s4706_s0, %s4115_s8  ;;  %s4120_s1 = sshll.u32 %s4389_s25, 4  ;;  %s4121_s1 = int_to_ptr.vmem [resolvable:$false] %s4120_s1 }
  0xa6   : > { %s4122_s20 = scalar_lea.vmem %s4121_s1, 2048  ;;  %p4123_p9 = scmp.lt.s32.totalorder %s4706_s0, %s4121_s1 }
  0xa7   : > { %p4118_p7 = pnand %p4116_p4, %p4620_p2  ;;  %p4124_p5 = scmp.lt.s32.totalorder %s4122_s20, %s4115_s8 }
  0xa9   : > { %p4119_p0 = pneg %p4118_p7  ;;  %p4125_p1 = por %p4124_p5, %p4123_p9 }
  0xab   : > { %p4126_p3 = pnand %p4125_p1, %p4119_p0 }
  0xad   : > { %4129 = shalt.err (!%p4126_p3)
}
  0xae   : > { %p5407_p12 = scmp.ne.s32.totalorder %s5400_s16, 0  ;;  %s4390_s22 = smov [#allocation11]  }
  0xaf   : > { %s459_s19 = sshll.u32 %s4390_s22, 4  ;;  %s4737_s10 = scalar_lea.hbm %s5339_s11, %s4593_s12  ;;  %s460_s19 = int_to_ptr.vmem [resolvable:$true] %s459_s19 }
  0xb0   : > { %3835 = dma.hbm_to_vmem [thread:$0]  (!%p5407_p12), %s4703_s21, 1024, %s4706_s0, %s4614_s23, %s5403_s30, %s5403_s30, %s5402_s2  }
  0xb1   : > { %s5408_s4 = sld [smem:[#allocation45_spill]] }
  0xb7   : > { %s4130_s8 = scalar_lea.hbm %s5408_s4, 1024 }
  0xb8   : > { %p4131_p5 = scmp.ne.s32.totalorder %s5408_s4, %s4130_s8  ;;  %p4137_p11 = scmp.lt.u32.totalorder %s4130_s8, %s5408_s4 }
  0xba   : > { %p4133_p6 = pnand %p4131_p5, %p5405_p8 }
  0xbc   : > { %p4134_p10 = pneg %p4133_p6 }
  0xbe   : > { %p4139_p13 = pnand %p4137_p11, %p4134_p10 }
  0xc0   : > { %4142 = shalt.err (!%p4139_p13)
}
  0xc1   : > { %s4143_s20 = scalar_lea.vmem %s460_s19, 1024  ;;  %p4151_p9 = scmp.lt.s32.totalorder %s460_s19, %s460_s19 }
  0xc2   : > { %p4144_p4 = scmp.ne.s32.totalorder %s460_s19, %s4143_s20  ;;  %p4152_p1 = scmp.lt.s32.totalorder %s4143_s20, %s4143_s20 }
  0xc4   : > { %p4146_p7 = pnand %p4144_p4, %p5405_p8  ;;  %p4153_p3 = por %p4152_p1, %p4151_p9 }
  0xc6   : > { %p4147_p0 = pneg %p4146_p7 }
  0xc8   : > { %p4154_p12 = pnand %p4153_p3, %p4147_p0 }
  0xca   : > { %4157 = shalt.err (!%p4154_p12)
}
  0xcb   : > { %p5409_p5 = scmp.ne.s32.totalorder %s5394_s27, 0  ;;  %s581_s29 = scalar_lea.vmem [#allocation17], %s4590_s28 }
  0xcc   : > { %s588_s26 = sshll.u32 %s581_s29, 4  ;;  %s4391_s6 = smov [#allocation12]   ;;  %s4761_s26 = int_to_ptr.vmem [resolvable:$true] %s588_s26 }
  0xcd   : > { %3819 = dma.hbm_to_vmem [thread:$0]  (!%p5409_p5), %s5408_s4, 1024, %s460_s19, [#allocation10], %s5403_s30, %s5403_s30, %s5402_s2  }
  0xce   : > { %s4763_s8 = sshll.u32 %s4391_s6, 4  ;;  %s4158_s25 = scalar_lea.hbm %s4737_s10, 1024  ;;  %s473_s8 = int_to_ptr.vmem [resolvable:$true] %s4763_s8 }
  0xcf   : > { %p4159_p12 = scmp.ne.s32.totalorder %s4737_s10, %s4158_s25  ;;  %s4163_s0 = scalar_lea.hbm %s5339_s11, 3072 }
  0xd0   : > { %p4164_p11 = scmp.lt.u32.totalorder %s4737_s10, %s5339_s11  ;;  %p4165_p13 = scmp.lt.u32.totalorder %s4163_s0, %s4158_s25 }
  0xd1   : > { %p4161_p6 = pnand %p4159_p12, %p4620_p2  ;;  %p4167_p7 = scmp.lt.u32.totalorder %s4158_s25, %s4737_s10 }
  0xd2   : > { %p4166_p4 = por %p4165_p13, %p4164_p11 }
  0xd3   : > { %p4162_p10 = pneg %p4161_p6 }
  0xd4   : > { %p4168_p0 = por %p4167_p7, %p4166_p4 }
  0xd6   : > { %p4169_p9 = pnand %p4168_p0, %p4162_p10 }
  0xd8   : > { %4172 = shalt.err (!%p4169_p9)
}
  0xd9   : > { %s4173_s19 = scalar_lea.vmem %s4761_s26, 1024  ;;  %s4392_s14 = smov [#allocation17]  }
  0xda   : > { %p4174_p1 = scmp.ne.s32.totalorder %s4761_s26, %s4173_s19  ;;  %s4178_s29 = sshll.u32 %s4392_s14, 4  ;;  %s4179_s29 = int_to_ptr.vmem [resolvable:$false] %s4178_s29 }
  0xdb   : > { %s4180_s6 = scalar_lea.vmem %s4179_s29, 2048  ;;  %p4181_p6 = scmp.lt.s32.totalorder %s4761_s26, %s4179_s29 }
  0xdc   : > { %p4176_p3 = pnand %p4174_p1, %p4620_p2  ;;  %p4182_p5 = scmp.lt.s32.totalorder %s4180_s6, %s4173_s19 }
  0xde   : > { %p4177_p12 = pneg %p4176_p3  ;;  %p4183_p11 = por %p4182_p5, %p4181_p6 }
  0xe0   : > { %p4184_p13 = pnand %p4183_p11, %p4177_p12 }
  0xe2   : > { %4187 = shalt.err (!%p4184_p13)
}
  0xe3   : > { %p5410_p10 = scmp.ne.s32.totalorder %s5400_s16, 0  ;;  %s4188_s21 = scalar_lea.hbm %s5333_s5, 1024 }
  0xe4   : > { %p4189_p5 = scmp.ne.s32.totalorder %s5333_s5, %s4188_s21  ;;  %p4195_p0 = scmp.lt.u32.totalorder %s4188_s21, %s5333_s5 }
  0xe5   : > { %3838 = dma.hbm_to_vmem [thread:$0]  (!%p5410_p10), %s4737_s10, 1024, %s4761_s26, %s4614_s23, %s5403_s30, %s5403_s30, %s5402_s2  }
  0xe6   : > { %p4191_p4 = pnand %p4189_p5, %p5405_p8 }
  0xe8   : > { %p4192_p7 = pneg %p4191_p4 }
  0xea   : > { %p4197_p9 = pnand %p4195_p0, %p4192_p7 }
  0xec   : > { %4200 = shalt.err (!%p4197_p9)
}
  0xed   : > { %s4201_s14 = scalar_lea.vmem %s473_s8, 1024  ;;  %p4209_p6 = scmp.lt.s32.totalorder %s473_s8, %s473_s8 }
  0xee   : > { %p4202_p1 = scmp.ne.s32.totalorder %s473_s8, %s4201_s14  ;;  %p4210_p11 = scmp.lt.s32.totalorder %s4201_s14, %s4201_s14 }
  0xf0   : > { %p4204_p3 = pnand %p4202_p1, %p5405_p8  ;;  %p4211_p13 = por %p4210_p11, %p4209_p6 }
  0xf2   : > { %p4205_p12 = pneg %p4204_p3 }
  0xf4   : > { %p4212_p10 = pnand %p4211_p13, %p4205_p12 }
  0xf6   : > { %4215 = shalt.err (!%p4212_p10)
}
  0xf7   : > { %p5411_p5 = scmp.ne.s32.totalorder %s5394_s27, 0  ;;  %s4393_s29 = smov [#allocation19]  }
  0xf8   : > { %s485_s6 = sshll.u32 %s4393_s29, 4  ;;  %s4216_s21 = scalar_lea.hbm %s5343_s15, 2048  ;;  %s486_s6 = int_to_ptr.vmem [resolvable:$true] %s485_s6 }
  0xf9   : > { %3822 = dma.hbm_to_vmem [thread:$0]  (!%p5411_p5), %s5333_s5, 1024, %s473_s8, [#allocation13], %s5403_s30, %s5403_s30, %s5402_s2  }
  0xfa   : > { %p4217_p10 = scmp.ne.s32.totalorder %s5343_s15, %s4216_s21  ;;  %p4223_p0 = scmp.lt.u32.totalorder %s4216_s21, %s5343_s15 }
  0xfc   : > { %p4219_p4 = pnand %p4217_p10, %p5405_p8 }
  0xfe   : > { %p4220_p7 = pneg %p4219_p4 }
 0x100   : > { %p4225_p9 = pnand %p4223_p0, %p4220_p7 }
 0x102   : > { %4228 = shalt.err (!%p4225_p9)
}
 0x103   : > { %s4229_s8 = scalar_lea.vmem %s486_s6, 2048  ;;  %p4237_p6 = scmp.lt.s32.totalorder %s486_s6, %s486_s6 }
 0x104   : > { %p4230_p1 = scmp.ne.s32.totalorder %s486_s6, %s4229_s8  ;;  %p4238_p11 = scmp.lt.s32.totalorder %s4229_s8, %s4229_s8 }
 0x106   : > { %p4232_p3 = pnand %p4230_p1, %p5405_p8  ;;  %p4239_p13 = por %p4238_p11, %p4237_p6 }
 0x108   : > { %p4233_p12 = pneg %p4232_p3 }
 0x10a   : > { %p4240_p2 = pnand %p4239_p13, %p4233_p12 }
 0x10c   : > { %4243 = shalt.err (!%p4240_p2)
}
 0x10d   : > { %s4394_s14 = smov 128   ;;  %s4395_s10 = smov 8  }
 0x10e   : > { %3825 = dma.hbm_to_vmem [thread:$0]  (!%p5411_p5), %s5343_s15, 2048, %s486_s6, [#allocation10], %s4394_s14, %s4394_s14, %s4395_s10  }
 0x10f   : > { %s4834_s1 = scalar_lea.hbm %s5341_s13, %s4593_s12  ;;  %s608_s21 = scalar_lea.vmem [#allocation18], %s4590_s28 }
 0x110   : > { %s615_s0 = sshll.u32 %s608_s21, 4  ;;  %s4244_s20 = scalar_lea.hbm %s4834_s1, 1024  ;;  %s4837_s0 = int_to_ptr.vmem [resolvable:$true] %s615_s0 }
 0x111   : > { %p4245_p2 = scmp.ne.s32.totalorder %s4834_s1, %s4244_s20  ;;  %p5412_p8 = scmp.ne.s32.totalorder %s5401_s18, 0 }
 0x112   : > { %s4249_s22 = scalar_lea.hbm %s5341_s13, 3072  ;;  %p4250_p5 = scmp.lt.u32.totalorder %s4834_s1, %s5341_s13 }
 0x113   : > { %p4247_p10 = pnand %p4245_p2, %p5412_p8  ;;  %p4251_p7 = scmp.lt.u32.totalorder %s4249_s22, %s4244_s20 }
 0x114   : > { %p4253_p9 = scmp.lt.u32.totalorder %s4244_s20, %s4834_s1 }
 0x115   : > { %p4248_p4 = pneg %p4247_p10  ;;  %p4252_p0 = por %p4251_p7, %p4250_p5 }
 0x117   : > { %p4254_p1 = por %p4253_p9, %p4252_p0 }
 0x119   : > { %p4255_p3 = pnand %p4254_p1, %p4248_p4 }
 0x11b   : > { %4258 = shalt.err (!%p4255_p3)
}
 0x11c   : > { %s4259_s28 = scalar_lea.vmem %s4837_s0, 1024  ;;  %s4396_s8 = smov [#allocation18]  }
 0x11d   : > { %p4260_p12 = scmp.ne.s32.totalorder %s4837_s0, %s4259_s28  ;;  %s4264_s14 = sshll.u32 %s4396_s8, 4  ;;  %s4265_s14 = int_to_ptr.vmem [resolvable:$false] %s4264_s14 }
 0x11e   : > { %s4266_s10 = scalar_lea.vmem %s4265_s14, 2048  ;;  %p4267_p13 = scmp.lt.s32.totalorder %s4837_s0, %s4265_s14 }
 0x11f   : > { %p4262_p6 = pnand %p4260_p12, %p5412_p8  ;;  %p4268_p2 = scmp.lt.s32.totalorder %s4266_s10, %s4259_s28 }
 0x121   : > { %p4263_p11 = pneg %p4262_p6  ;;  %p4269_p10 = por %p4268_p2, %p4267_p13 }
 0x123   : > { %p4270_p5 = pnand %p4269_p10, %p4263_p11 }
 0x125   : > { %4273 = shalt.err (!%p4270_p5)
}
 0x126   : > { %p5413_p4 = scmp.ne.s32.totalorder %s5400_s16, 0  ;;  %p5414_p8 = scmp.ne.s32.totalorder %s5393_s24, 0 }
 0x128   : > { %3841 = dma.hbm_to_vmem [thread:$0]  (!%p5413_p4), %s4834_s1, 1024, %s4837_s0, %s4614_s23, %s5403_s30, %s5403_s30, %s5402_s2  }
 0x129   : > { %633 = sbr.rel (%p5414_p8) target bundleno = 2808 (0xaf8), region = 80 }
 0x130   : > { %s5415_s18 = sld [smem:[#allocation36_spill]] }
 0x136   : > { %p5416_p7 = scmp.eq.s32.totalorder %s5415_s18, 0 }
 0x138   : > { %4341 = dma.done.wait (%p5416_p7), [#allocation7], 1024   ;;  %p5417_p0 = pmov %p5416_p7 }
 0x13a   : > { %4343 = vsyncadd (%p5417_p0), [#allocation7], 4294966272  ;;  %p5418_p9 = pmov %p5417_p0 }
 0x13b   : > { %p5419_p1 = pmov %p5417_p0 }
 0x13c   : > { %4345 = dma.done.wait (%p5418_p9), [#allocation10], 2048  }
 0x13d   : > { %4347 = vsyncadd (%p5419_p1), [#allocation10], 4294965248  ;;  %p5420_p3 = pmov %p5417_p0 }
 0x13e   : > { %p5421_p12 = pmov %p5417_p0 }
 0x13f   : > { %4349 = dma.done.wait (%p5420_p3), [#allocation13], 1024  }
 0x140   : > { %4351 = vsyncadd (%p5421_p12), [#allocation13], 4294966272  ;;  %s5422_s24 = sld [smem:[#allocation34_spill]]  ;;  %s5423_s16 = sld [smem:[#allocation37_spill]] }
 0x141   : > { %s651_s23 = sand.u32 1, %s5415_s18  }
 0x142   : > { %s652_s26 = scalar_lea.sflag [#allocation7], %s651_s23 }
 0x146   : > { %s653_s2 = sand.u32 1, %s5422_s24   ;;  %p5424_p6 = scmp.ne.s32.totalorder %s5423_s16, 0 }
 0x147   : > { %s3058_s30 = sshll.u32 %s653_s2, 6 }
 0x148   : > { %s4880_s29 = scalar_lea.vmem [#allocation14], %s3058_s30 }
 0x149   : > { %4353 = dma.done.wait (%p5424_p6), %s652_s26, 5120  }
 0x14a   : > { %4355 = vsyncadd (%p5424_p6), %s652_s26, 4294962176  ;;  %s4886_s25 = scalar_lea.vmem [#allocation15], %s3058_s30  ;;  %s4888_s17 = scalar_lea.vmem [#allocation16], %s3058_s30 }
 0x14b   : > { %s4890_s1 = scalar_lea.vmem [#allocation17], %s3058_s30  ;;  %s4892_s21 = scalar_lea.vmem [#allocation18], %s3058_s30 }
 0x14c   : > { %p5425_p11 = pmov %p5417_p0 }
 0x14d   : > { %p5426_p13 = pmov %p5417_p0 }
 0x14e   : > { %4357 = dma.done.wait (%p5425_p11), [#allocation10], 2048  }
 0x14f   : > { %4359 = vsyncadd (%p5426_p13), [#allocation10], 4294965248  ;;  %p769_p2 = scmp.lt.s32.totalorder %s5415_s18, 2  ;;  %s5428_s28 = sld [smem:[#allocation48_spill]] }
 0x150   : > { %s5429_s24 = sld [smem:[#allocation49_spill]]  ;;  %s5430_s30 = sld [smem:[#allocation50_spill]] }
 0x151   : > { %s4900_s0 = scalar_select %p769_p2, %s5415_s18, 2 }
 0x152   : > { %p5431_p10 = scmp.ne.s32.totalorder %s5415_s18, 0 }
 0x154   : > { %785 = sbr.rel (%p5431_p10) target bundleno = 378 (0x17a), region = 124 }
 0x155   : > { %s774_s8 = scalar_lea.vmem %s5428_s28, %s4900_s0 }
 0x156   : > { %s777_s16 = scalar_lea.vmem %s5429_s24, %s4900_s0  ;;  %s780_s26 = scalar_lea.vmem %s5430_s30, %s4900_s0 }
 0x15b   : > { %s4397_s20 = smov [#allocation2]   ;;  %s5432_s22 = sld [smem:[#allocation42_spill]] }
 0x15c   : > { %s793_s27 = sshll.u32 %s4397_s20, 4  ;;  %s794_s27 = int_to_ptr.vmem [resolvable:$true] %s793_s27 }
 0x161   : > { %s4274_s4 = scalar_lea.hbm %s5432_s22, 2048 }
 0x162   : > { %p4275_p5 = scmp.ne.s32.totalorder %s5432_s22, %s4274_s4  ;;  %p4278_p4 = scmp.lt.u32.totalorder %s4274_s4, %s5432_s22 }
 0x164   : > { %p4280_p8 = pnand %p4278_p4, %p4275_p5 }
 0x166   : > { %4283 = shalt.err (!%p4280_p8)  }
 0x167   : > { %s4284_s10 = scalar_lea.vmem %s794_s27, 2048  ;;  %p4289_p0 = scmp.lt.s32.totalorder %s794_s27, %s794_s27 }
 0x168   : > { %p4285_p7 = scmp.ne.s32.totalorder %s794_s27, %s4284_s10  ;;  %p4290_p9 = scmp.lt.s32.totalorder %s4284_s10, %s4284_s10 }
 0x16a   : > { %p4291_p1 = por %p4290_p9, %p4289_p0 }
 0x16c   : > { %p4292_p3 = pnand %p4291_p1, %p4285_p7 }
 0x16e   : > { %4295 = shalt.err (!%p4292_p3)  }
 0x16f   : > { %796 = dma.hbm_to_vmem [thread:$0]  %s5432_s22, 2048, %s794_s27, [#allocation21] }
 0x170   : > { %4360 = dma.done.wait [#allocation21], 2048 }
 0x171   : > { %4361 = vsyncadd [#allocation21], 4294965248  ;;  %v4398_v0 = vmov 0.0  }
 0x172   : > { %800 = vst [vmem:[#allocation3] sm:$0xff] %v4398_v0  ;;  %801 = vst [vmem:[#allocation3 + $0x8] sm:$0xff] %v4398_v0 }
 0x173   : > { %802 = vst [vmem:[#allocation3 + $0x10] sm:$0xff] %v4398_v0  ;;  %803 = vst [vmem:[#allocation3 + $0x18] sm:$0xff] %v4398_v0 }
 0x174   : > { %804 = vst [vmem:[#allocation3 + $0x20] sm:$0xff] %v4398_v0  ;;  %805 = vst [vmem:[#allocation3 + $0x28] sm:$0xff] %v4398_v0 }
 0x175   : > { %806 = vst [vmem:[#allocation3 + $0x30] sm:$0xff] %v4398_v0  ;;  %807 = vst [vmem:[#allocation3 + $0x38] sm:$0xff] %v4398_v0 }
 0x176   : > { %808 = vst [vmem:[#allocation3 + $0x40] sm:$0xff] %v4398_v0  ;;  %809 = vst [vmem:[#allocation3 + $0x48] sm:$0xff] %v4398_v0 }
 0x177   : > { %810 = vst [vmem:[#allocation3 + $0x50] sm:$0xff] %v4398_v0  ;;  %811 = vst [vmem:[#allocation3 + $0x58] sm:$0xff] %v4398_v0 }
 0x178   : > { %812 = vst [vmem:[#allocation3 + $0x60] sm:$0xff] %v4398_v0  ;;  %813 = vst [vmem:[#allocation3 + $0x68] sm:$0xff] %v4398_v0 }
 0x179   : > { %814 = vst [vmem:[#allocation3 + $0x70] sm:$0xff] %v4398_v0  ;;  %815 = vst [vmem:[#allocation3 + $0x78] sm:$0xff] %v4398_v0 }
 0x17a PF: > { %v4932_v1 = vld [vmem:[#allocation3] sm:$0xff]  ;;  %v4934_v2 = vld [vmem:[#allocation3 + $0x8] sm:$0xff]  ;;  %v4936_v3 = vld [vmem:[#allocation3 + $0x10] sm:$0xff]  ;;  %s5434_s4 = sld [smem:[#allocation36_spill]]  ;;  %s5435_s2 = sld [smem:[#allocation47_spill]] }
 0x17b   : > { %v864_v4 = vpack.c.bf16 %v4934_v2, %v4932_v1  ;;  %v4940_v5 = vld [vmem:[#allocation3 + $0x18] sm:$0xff]  ;;  %v4944_v7 = vld [vmem:[#allocation3 + $0x20] sm:$0xff]  ;;  %v4946_v8 = vld [vmem:[#allocation3 + $0x28] sm:$0xff] }
 0x17c   : > { %v865_v6 = vpack.c.bf16 %v4940_v5, %v4936_v3  ;;  %v4948_v9 = vld [vmem:[#allocation3 + $0x30] sm:$0xff]  ;;  %v866_v10 = vpack.c.bf16 %v4946_v8, %v4944_v7  ;;  %v4952_v11 = vld [vmem:[#allocation3 + $0x38] sm:$0xff]  ;;  %v3902_v12 = vld [vmem:[#allocation11] sm:$0xff]  }
 0x17d   : > { %3368 = vmatprep.subr.bf16.mxu0 %v864_v4  ;;  %3384 = vmatprep.mubr.bf16.mxu0 %v3902_v12  ;;  %v867_v13 = vpack.c.bf16 %v4952_v11, %v4948_v9  ;;  %v4956_v14 = vld [vmem:[#allocation3 + $0x40] sm:$0xff]  ;;  %v4958_v15 = vld [vmem:[#allocation3 + $0x48] sm:$0xff]  ;;  %v3904_v27 = vld [vmem:[#allocation11 + $0x10] sm:$0xff]  }
 0x17e   : > { %3369 = vmatpush3.bf16.msra.mxu0 %v864_v4  ;;  %v868_v16 = vpack.c.bf16 %v4958_v15, %v4956_v14  ;;  %v4962_v17 = vld [vmem:[#allocation3 + $0x50] sm:$0xff]  ;;  %v4964_v18 = vld [vmem:[#allocation3 + $0x58] sm:$0xff]  ;;  %v3903_v26 = vld [vmem:[#allocation11 + $0x8] sm:$0xff]  }
 0x17f   : > { %3370 = vmatprep.subr.bf16.mxu0 %v865_v6  ;;  %v4966_v19 = vld [vmem:[#allocation3 + $0x60] sm:$0xff]  ;;  %v4968_v20 = vld [vmem:[#allocation3 + $0x68] sm:$0xff]  ;;  %v869_v21 = vpack.c.bf16 %v4964_v18, %v4962_v17  ;;  %v3905_v28 = vld [vmem:[#allocation11 + $0x18] sm:$0xff]  }
 0x180   : > { %5433 = vst [vmem:[#allocation40_spill] sm:$0xff] %v4968_v20  ;;  %v4972_v22 = vld [vmem:[#allocation3 + $0x70] sm:$0xff]  ;;  %v4974_v23 = vld [vmem:[#allocation3 + $0x78] sm:$0xff]  ;;  %v870_v24 = vpack.c.bf16 %v4968_v20, %v4966_v19  ;;  %v3906_v29 = vld [vmem:[#allocation11 + $0x20] sm:$0xff]   ;;  %s5436_s30 = scalar_lea.vmem %s5435_s2, %s4900_s0  ;;  %p3107_p12 = scmp.ge.s32.totalorder %s5434_s4, 2 }
 0x181   : > { %v871_v25 = vpack.c.bf16 %v4974_v23, %v4972_v22  ;;  %v3907_v30 = vld [vmem:[#allocation11 + $0x28] sm:$0xff]   ;;  %v3908_v31 = vld [vmem:[#allocation11 + $0x30] sm:$0xff]   ;;  %v3909_v32 = vld [vmem:[#allocation11 + $0x38] sm:$0xff]  }
 0x182   : > { %3371 = vmatpush3.bf16.msra.mxu0 %v865_v6  ;;  %v3910_v33 = vld [vmem:[#allocation6] sm:$0xff]   ;;  %v834_v34 = vld [vmem:[#allocation2 + $0x10] sm:$0xff]  ;;  %v835_v36 = vld [vmem:[#allocation2 + $0x18] sm:$0xff] }
 0x183   : > { %3372 = vmatprep.subr.bf16.mxu0 %v866_v10  ;;  %3416 = vmatprep.mubr.bf16.mxu1 %v3910_v33  ;;  %v832_v37 = vld [vmem:[#allocation2] sm:$0xff]  ;;  %v833_v39 = vld [vmem:[#allocation2 + $0x8] sm:$0xff]  ;;  %v838_v48 = vld [vmem:[#allocation2 + $0x30] sm:$0xff] }
 0x184   : > { %v839_v50 = vld [vmem:[#allocation2 + $0x38] sm:$0xff]  ;;  %v836_v51 = vld [vmem:[#allocation2 + $0x20] sm:$0xff]  ;;  %v837_v53 = vld [vmem:[#allocation2 + $0x28] sm:$0xff] }
 0x185   : > { %v842_v62 = vld [vmem:[#allocation2 + $0x50] sm:$0xff]  ;;  %v843_v0 = vld [vmem:[#allocation2 + $0x58] sm:$0xff]  ;;  %v840_v4 = vld [vmem:[#allocation2 + $0x40] sm:$0xff] }
 0x186   : > { %3373 = vmatpush3.bf16.msra.mxu0 %v866_v10  ;;  %v841_v10 = vld [vmem:[#allocation2 + $0x48] sm:$0xff] }
 0x187   : > { %3374 = vmatprep.subr.bf16.mxu0 %v867_v13  ;;  %v845_v33 = vld [vmem:[#allocation2 + $0x68] sm:$0xff] }
 0x18a   : > { %3375 = vmatpush3.bf16.msra.mxu0 %v867_v13 }
 0x18b   : > { %3376 = vmatprep.subr.bf16.mxu0 %v868_v16 }
 0x18e   : > { %3377 = vmatpush3.bf16.msra.mxu0 %v868_v16 }
 0x18f   : > { %3378 = vmatprep.subr.bf16.mxu0 %v869_v21 }
 0x192   : > { %3379 = vmatpush3.bf16.msra.mxu0 %v869_v21 }
 0x193   : > { %3380 = vmatprep.subr.bf16.mxu0 %v870_v24 }
 0x196   : > { %3381 = vmatpush3.bf16.msra.mxu0 %v870_v24 }
 0x197   : > { %3382 = vmatprep.subr.bf16.mxu0 %v871_v25 }
 0x19a   : > { %3383 = vmatpush3.bf16.msra.mxu0 %v871_v25 }
 0x19d   : > { %3385 = vmatmul.mubr.bf16.vlgmr.msra.gmra.mrb[0].mxu0 %v3903_v26 }
 0x19e   : > { %3388 = vmatprep.mubr.bf16.mxu0 %v3904_v27 }
 0x1a5   : > { %3389 = vmatmul.mubr.bf16.gmra.mrb[4].mxu0 %v3905_v28  ;;  %v846_v28 = vld [vmem:[#allocation2 + $0x70] sm:$0xff] }
 0x1a6   : > { %3392 = vmatprep.mubr.bf16.mxu0 %v3906_v29 }
 0x1ad   : > { %3393 = vmatmul.mubr.bf16.gmra.mrb[8].mxu0 %v3907_v30  ;;  %v847_v30 = vld [vmem:[#allocation2 + $0x78] sm:$0xff] }
 0x1ae   : > { %3396 = vmatprep.mubr.bf16.mxu0 %v3908_v31  ;;  %v844_v31 = vld [vmem:[#allocation2 + $0x60] sm:$0xff] }
 0x1b5   : > { %3397 = vmatmul.mubr.bf16.gmra.mrb[12].mxu0 %v3909_v32 }
 0x270   : > { %v3386_v35 = vpop.f32.mrb[0].mxu0 }
 0x271   : > { %v954_v38 = vpop.f32.mrb[1].mxu0  ;;  %v4980_v41 = vadd.f32 %v3386_v35, %v834_v34 }
 0x272   : > { %v3387_v40 = vpop.f32.mrb[2].mxu0  ;;  %v4984_v44 = vadd.f32 %v954_v38, %v832_v37 }
 0x273   : > { %v4982_v42 = vadd.f32 %v3387_v40, %v835_v36  ;;  %v957_v43 = vpop.f32.mrb[3].mxu0 }
 0x274   : > { %v4986_v45 = vadd.f32 %v957_v43, %v833_v39 }
 0x275   : > { %v4990_v46 = vpack.c.bf16 %v4982_v42, %v4980_v41 }
 0x276   : > { %v4994_v47 = vpack.c.bf16 %v4986_v45, %v4984_v44 }
 0x278   : > { %v3390_v49 = vpop.f32.mrb[4].mxu0  ;;  %3400 = vmatprep.subr.bf16.mxu1 %v4994_v47 }
 0x279   : > { %v970_v52 = vpop.f32.mrb[5].mxu0  ;;  %3401 = vmatpush3.bf16.msra.mxu1 %v4994_v47  ;;  %v4999_v55 = vadd.f32 %v3390_v49, %v838_v48  ;;  %v3911_v48 = vld [vmem:[#allocation6 + $0x8] sm:$0xff]   ;;  %v3912_v49 = vld [vmem:[#allocation6 + $0x10] sm:$0xff]  }
 0x27a   : > { %v3391_v54 = vpop.f32.mrb[6].mxu0  ;;  %3402 = vmatprep.subr.bf16.mxu1 %v4990_v46  ;;  %v5003_v58 = vadd.f32 %v970_v52, %v836_v51  ;;  %v3914_v51 = vld [vmem:[#allocation6 + $0x20] sm:$0xff]   ;;  %v3915_v52 = vld [vmem:[#allocation6 + $0x28] sm:$0xff]  }
 0x27b   : > { %v5001_v56 = vadd.f32 %v3391_v54, %v839_v50  ;;  %v973_v57 = vpop.f32.mrb[7].mxu0  ;;  %v3913_v50 = vld [vmem:[#allocation6 + $0x18] sm:$0xff]  }
 0x27c   : > { %v5005_v59 = vadd.f32 %v973_v57, %v837_v53  ;;  %v3916_v53 = vld [vmem:[#allocation6 + $0x30] sm:$0xff]   ;;  %v3917_v54 = vld [vmem:[#allocation6 + $0x38] sm:$0xff]   ;;  %v3918_v57 = vld [vmem:[#allocation9] sm:$0xff]  }
 0x27d   : > { %v5009_v60 = vpack.c.bf16 %v5001_v56, %v4999_v55  ;;  %3403 = vmatpush3.bf16.msra.mxu1 %v4990_v46  ;;  %3448 = vmatprep.mubr.bf16.mxu0 %v3918_v57 }
 0x27e   : > { %v5014_v61 = vpack.c.bf16 %v5005_v59, %v5003_v58 }
 0x280   : > { %v3394_v63 = vpop.f32.mrb[8].mxu0  ;;  %3404 = vmatprep.subr.bf16.mxu1 %v5014_v61 }
 0x281   : > { %v986_v6 = vpop.f32.mrb[9].mxu0  ;;  %3405 = vmatpush3.bf16.msra.mxu1 %v5014_v61  ;;  %v5019_v13 = vadd.f32 %v3394_v63, %v842_v62  ;;  %v3926_v62 = vld [vmem:[%s4886_s25] sm:$0xff]   ;;  %v3927_v63 = vld [vmem:[%s4886_s25 + $0x8] sm:$0xff]  }
 0x282   : > { %v3395_v12 = vpop.f32.mrb[10].mxu0  ;;  %3406 = vmatprep.subr.bf16.mxu1 %v5009_v60  ;;  %v5023_v24 = vadd.f32 %v986_v6, %v840_v4  ;;  %v3929_v4 = vld [vmem:[%s4886_s25 + $0x18] sm:$0xff]   ;;  %v3930_v6 = vld [vmem:[%s4886_s25 + $0x20] sm:$0xff]  }
 0x283   : > { %v5021_v16 = vadd.f32 %v3395_v12, %v843_v0  ;;  %v989_v21 = vpop.f32.mrb[11].mxu0  ;;  %v3928_v0 = vld [vmem:[%s4886_s25 + $0x10] sm:$0xff]   ;;  %v3185_v12 = vld [vmem:[%s4880_s29 + $0x8] sm:$0xff]  }
 0x284   : > { %v5025_v25 = vadd.f32 %v989_v21, %v841_v10  ;;  %v3931_v10 = vld [vmem:[%s4886_s25 + $0x28] sm:$0xff]   ;;  %v3154_v21 = vld [vmem:[%s4880_s29] sm:$0xff]  }
 0x285   : > { %v5029_v26 = vpack.c.bf16 %v5021_v16, %v5019_v13  ;;  %3407 = vmatpush3.bf16.msra.mxu1 %v5009_v60 }
 0x286   : > { %v5034_v27 = vpack.c.bf16 %v5025_v25, %v5023_v24 }
 0x288   : > { %v3398_v29 = vpop.f32.mrb[12].mxu0  ;;  %3408 = vmatprep.subr.bf16.mxu1 %v5034_v27 }
 0x289   : > { %v1002_v32 = vpop.f32.mrb[13].mxu0  ;;  %3409 = vmatpush3.bf16.msra.mxu1 %v5034_v27  ;;  %v5039_v35 = vadd.f32 %v3398_v29, %v846_v28  ;;  %v3159_v28 = vunpack.c.l.bf16 %v3185_v12  ;;  %v3155_v29 = vunpack.c.l.bf16 %v3154_v21 }
 0x28a   : > { %v3399_v34 = vpop.f32.mrb[14].mxu0  ;;  %3410 = vmatprep.subr.bf16.mxu1 %v5029_v26  ;;  %v5043_v38 = vadd.f32 %v1002_v32, %v844_v31  ;;  %v3156_v32 = vunpack.c.h.bf16 %v3154_v21 }
 0x28b   : > { %v5041_v36 = vadd.f32 %v3399_v34, %v847_v30  ;;  %v1005_v37 = vpop.f32.mrb[15].mxu0  ;;  %v3160_v30 = vunpack.c.h.bf16 %v3185_v12 }
 0x28c   : > { %v5045_v39 = vadd.f32 %v1005_v37, %v845_v33 }
 0x28d   : > { %v5049_v40 = vpack.c.bf16 %v5041_v36, %v5039_v35  ;;  %3411 = vmatpush3.bf16.msra.mxu1 %v5029_v26 }
 0x28e   : > { %v5054_v43 = vpack.c.bf16 %v5045_v39, %v5043_v38 }
 0x290   : > { %3412 = vmatprep.subr.bf16.mxu1 %v5054_v43 }
 0x291   : > { %3413 = vmatpush3.bf16.msra.mxu1 %v5054_v43 }
 0x292   : > { %3414 = vmatprep.subr.bf16.mxu1 %v5049_v40 }
 0x295   : > { %3415 = vmatpush3.bf16.msra.mxu1 %v5049_v40 }
 0x296   : > { %3464 = vmatprep.subr.bf16.mxu1 %v3926_v62 }
 0x298   : > { %3417 = vmatmul.mubr.bf16.vlgmr.msra.gmra.mrb[0].mxu1 %v3911_v48 }
 0x299   : > { %3420 = vmatprep.mubr.bf16.mxu1 %v3912_v49  ;;  %3465 = vmatpush3.bf16.msra.mxu1 %v3926_v62  ;;  %v3187_v49 = vld [vmem:[%s4880_s29 + $0x18] sm:$0xff]  }
 0x29a   : > { %3466 = vmatprep.subr.bf16.mxu1 %v3927_v63  ;;  %v3167_v62 = vunpack.c.l.bf16 %v3187_v49 }
 0x29d   : > { %3467 = vmatpush3.bf16.msra.mxu1 %v3927_v63 }
 0x29e   : > { %3468 = vmatprep.subr.bf16.mxu1 %v3928_v0 }
 0x2a0   : > { %3421 = vmatmul.mubr.bf16.gmra.mrb[4].mxu1 %v3913_v50 }
 0x2a1   : > { %3424 = vmatprep.mubr.bf16.mxu1 %v3914_v51  ;;  %3469 = vmatpush3.bf16.msra.mxu1 %v3928_v0 }
 0x2a2   : > { %3470 = vmatprep.subr.bf16.mxu1 %v3929_v4 }
 0x2a5   : > { %3471 = vmatpush3.bf16.msra.mxu1 %v3929_v4 }
 0x2a6   : > { %3472 = vmatprep.subr.bf16.mxu1 %v3930_v6 }
 0x2a8   : > { %3425 = vmatmul.mubr.bf16.gmra.mrb[8].mxu1 %v3915_v52  ;;  %v3186_v52 = vld [vmem:[%s4880_s29 + $0x10] sm:$0xff]  }
 0x2a9   : > { %3428 = vmatprep.mubr.bf16.mxu1 %v3916_v53  ;;  %3473 = vmatpush3.bf16.msra.mxu1 %v3930_v6  ;;  %v3163_v4 = vunpack.c.l.bf16 %v3186_v52 }
 0x2aa   : > { %3474 = vmatprep.subr.bf16.mxu1 %v3931_v10 }
 0x2ad   : > { %3475 = vmatpush3.bf16.msra.mxu1 %v3931_v10  ;;  %v3168_v10 = vunpack.c.h.bf16 %v3187_v49 }
 0x2b0   : > { %3429 = vmatmul.mubr.bf16.gmra.mrb[12].mxu1 %v3917_v54 }
 0x36b   : > { %v3418_v31 = vpop.f32.mrb[0].mxu1 }
 0x36c   : > { %v1180_v33 = vadd.f32 %v3418_v31, %v3159_v28  ;;  %v1171_v34 = vpop.f32.mrb[1].mxu1  ;;  %v3164_v28 = vunpack.c.h.bf16 %v3186_v52 }
 0x36d   : > { %v1172_v37 = vadd.f32 %v3155_v29, %v1171_v34  ;;  %v3419_v48 = vpop.f32.mrb[2].mxu1 }
 0x36e   : > { %v1183_v50 = vadd.f32 %v3419_v48, %v3160_v30  ;;  %v1174_v51 = vpop.f32.mrb[3].mxu1  ;;  %v1236_v54 = vmax.f32 %v1180_v33, 0.0  ;;  %v3189_v48 = vld [vmem:[%s4880_s29 + $0x28] sm:$0xff]  }
 0x36f   : > { %v1175_v53 = vadd.f32 %v3156_v32, %v1174_v51  ;;  %v1234_v63 = vmax.f32 %v1172_v37, 0.0 }
 0x370   : > { %v1237_v57 = vmax.f32 %v1183_v50, 0.0  ;;  %v3188_v50 = vld [vmem:[%s4880_s29 + $0x20] sm:$0xff]  }
 0x371   : > { %v1235_v0 = vmax.f32 %v1175_v53, 0.0 }
 0x372   : > { %v1267_v6 = vpack.c.bf16 %v1237_v57, %v1236_v54  ;;  %v3175_v54 = vunpack.c.l.bf16 %v3189_v48 }
 0x373   : > { %v1266_v12 = vpack.c.bf16 %v1235_v0, %v1234_v63  ;;  %v3422_v21 = vpop.f32.mrb[4].mxu1  ;;  %v3171_v63 = vunpack.c.l.bf16 %v3188_v50 }
 0x374   : > { %v1196_v29 = vadd.f32 %v3422_v21, %v3167_v62  ;;  %v1187_v31 = vpop.f32.mrb[5].mxu1  ;;  %v3176_v62 = vunpack.c.h.bf16 %v3189_v48  ;;  %v3172_v21 = vunpack.c.h.bf16 %v3188_v50 }
 0x375   : > { %v1188_v34 = vadd.f32 %v3163_v4, %v1187_v31  ;;  %v3423_v30 = vpop.f32.mrb[6].mxu1  ;;  %3432 = vmatprep.subr.bf16.mxu0 %v1266_v12 }
 0x376   : > { %v1199_v32 = vadd.f32 %v3423_v30, %v3168_v10  ;;  %v1190_v33 = vpop.f32.mrb[7].mxu1  ;;  %3433 = vmatpush3.bf16.msra.mxu0 %v1266_v12  ;;  %v1240_v37 = vmax.f32 %v1196_v29, 0.0 }
 0x377   : > { %v1191_v51 = vadd.f32 %v3164_v28, %v1190_v33  ;;  %3434 = vmatprep.subr.bf16.mxu0 %v1267_v6  ;;  %v1238_v49 = vmax.f32 %v1188_v34, 0.0  ;;  %v3191_v28 = vld [vmem:[%s4880_s29 + $0x38] sm:$0xff]   ;;  %v3190_v33 = vld [vmem:[%s4880_s29 + $0x30] sm:$0xff]   ;;  %s1419_s29 = sld [smem:[#allocation5 + %s5434_s4]] }
 0x378   : > { %v1241_v53 = vmax.f32 %v1199_v32, 0.0  ;;  %v3184_v50 = vunpack.c.h.bf16 %v3191_v28 }
 0x379   : > { %v1239_v57 = vmax.f32 %v1191_v51, 0.0 }
 0x37a   : > { %v1269_v52 = vpack.c.bf16 %v1241_v53, %v1240_v37  ;;  %3435 = vmatpush3.bf16.msra.mxu0 %v1267_v6  ;;  %v3183_v37 = vunpack.c.l.bf16 %v3191_v28  ;;  %v3179_v53 = vunpack.c.l.bf16 %v3190_v33  ;;  %v3919_v28 = vld [vmem:[#allocation9 + $0x8] sm:$0xff]  }
 0x37b   : > { %v1268_v0 = vpack.c.bf16 %v1239_v57, %v1238_v49  ;;  %v3426_v4 = vpop.f32.mrb[8].mxu1 }
 0x37c   : > { %v1212_v10 = vadd.f32 %v3426_v4, %v3175_v54  ;;  %v1203_v31 = vpop.f32.mrb[9].mxu1 }
 0x37d   : > { %v1204_v12 = vadd.f32 %v3171_v63, %v1203_v31  ;;  %v3427_v30 = vpop.f32.mrb[10].mxu1  ;;  %3436 = vmatprep.subr.bf16.mxu0 %v1268_v0  ;;  %v3180_v63 = vunpack.c.h.bf16 %v3190_v33  ;;  %v3920_v33 = vld [vmem:[#allocation9 + $0x10] sm:$0xff]  }
 0x37e   : > { %v1215_v29 = vadd.f32 %v3427_v30, %v3176_v62  ;;  %v1206_v32 = vpop.f32.mrb[11].mxu1  ;;  %3437 = vmatpush3.bf16.msra.mxu0 %v1268_v0  ;;  %v1244_v51 = vmax.f32 %v1212_v10, 0.0 }
 0x37f   : > { %v1207_v34 = vadd.f32 %v3172_v21, %v1206_v32  ;;  %3438 = vmatprep.subr.bf16.mxu0 %v1269_v52  ;;  %v1242_v6 = vmax.f32 %v1204_v12, 0.0 }
 0x380   : > { %v1245_v20 = vmax.f32 %v1215_v29, 0.0 }
 0x381   : > { %v1243_v48 = vmax.f32 %v1207_v34, 0.0 }
 0x382   : > { %v1271_v49 = vpack.c.bf16 %v1245_v20, %v1244_v51  ;;  %3439 = vmatpush3.bf16.msra.mxu0 %v1269_v52  ;;  %v3921_v51 = vld [vmem:[#allocation9 + $0x18] sm:$0xff]  }
 0x383   : > { %v1270_v54 = vpack.c.bf16 %v1243_v48, %v1242_v6  ;;  %v3430_v57 = vpop.f32.mrb[12].mxu1  ;;  %v3923_v6 = vld [vmem:[#allocation9 + $0x28] sm:$0xff]   ;;  %v3924_v48 = vld [vmem:[#allocation9 + $0x30] sm:$0xff]  }
 0x384   : > { %v1228_v4 = vadd.f32 %v3430_v57, %v3183_v37  ;;  %v1219_v31 = vpop.f32.mrb[13].mxu1  ;;  %v3922_v37 = vld [vmem:[#allocation9 + $0x20] sm:$0xff]   ;;  %v3935_v57 = vld [vmem:[%s4888_s17 + $0x8] sm:$0xff]  }
 0x385   : > { %v1220_v62 = vadd.f32 %v3179_v53, %v1219_v31  ;;  %v3431_v30 = vpop.f32.mrb[14].mxu1  ;;  %3440 = vmatprep.subr.bf16.mxu0 %v1270_v54  ;;  %v3925_v53 = vld [vmem:[#allocation9 + $0x38] sm:$0xff]   ;;  %v5084_v31 = vld [vmem:[%s4888_s17 + $0x20] sm:$0xff]  }
 0x386   : > { %v1231_v0 = vadd.f32 %v3431_v30, %v3184_v50  ;;  %v1222_v21 = vpop.f32.mrb[15].mxu1  ;;  %3441 = vmatpush3.bf16.msra.mxu0 %v1270_v54  ;;  %v1248_v29 = vmax.f32 %v1228_v4, 0.0  ;;  %v3933_v50 = vld [vmem:[%s4886_s25 + $0x38] sm:$0xff]   ;;  %v3934_v54 = vld [vmem:[%s4888_s17] sm:$0xff]  }
 0x387   : > { %v1223_v10 = vadd.f32 %v3180_v63, %v1222_v21  ;;  %3442 = vmatprep.subr.bf16.mxu0 %v1271_v49  ;;  %v1246_v32 = vmax.f32 %v1220_v62, 0.0  ;;  %v3936_v63 = vld [vmem:[%s4888_s17 + $0x10] sm:$0xff]   ;;  %v5080_v4 = vld [vmem:[%s4888_s17 + $0x18] sm:$0xff]   ;;  %v5089_v62 = vld [vmem:[%s4888_s17 + $0x28] sm:$0xff]  }
 0x388   : > { %v1249_v12 = vmax.f32 %v1231_v0, 0.0 }
 0x389   : > { %v1247_v34 = vmax.f32 %v1223_v10, 0.0 }
 0x38a   : > { %v1273_v20 = vpack.c.bf16 %v1249_v12, %v1248_v29  ;;  %3443 = vmatpush3.bf16.msra.mxu0 %v1271_v49  ;;  %v3932_v49 = vld [vmem:[%s4886_s25 + $0x30] sm:$0xff]   ;;  %s1420_s25 = sadd.f32 1.0, %s1419_s29 }
 0x38b   : > { %v1272_v52 = vpack.c.bf16 %v1247_v34, %v1246_v32  ;;  %3476 = vmatprep.subr.bf16.mxu1 %v3932_v49 }
 0x38c   : > { %3477 = vmatpush3.bf16.msra.mxu1 %v3932_v49  ;;  %v5095_v30 = vstv %s1420_s25 }
 0x38d   : > { %3444 = vmatprep.subr.bf16.mxu0 %v1272_v52  ;;  %3478 = vmatprep.subr.bf16.mxu1 %v3933_v50  ;;  %v1424_v0 = vmul.f32 %v5095_v30, %v4980_v41  ;;  %v1422_v10 = vmul.f32 %v5095_v30, %v4984_v44  ;;  %v1425_v32 = vmul.f32 %v5095_v30, %v4982_v42 }
 0x38e   : > { %3445 = vmatpush3.bf16.msra.mxu0 %v1272_v52  ;;  %v1423_v52 = vmul.f32 %v5095_v30, %v4986_v45  ;;  %v1428_v41 = vmul.f32 %v5095_v30, %v4999_v55  ;;  %v1426_v44 = vmul.f32 %v5095_v30, %v5003_v58  ;;  %v1429_v49 = vmul.f32 %v5095_v30, %v5001_v56 }
 0x38f   : > { %3446 = vmatprep.subr.bf16.mxu0 %v1273_v20  ;;  %v1432_v58 = vmul.f32 %v5095_v30, %v5019_v13  ;;  %v1430_v56 = vmul.f32 %v5095_v30, %v5023_v24  ;;  %v1436_v24 = vmul.f32 %v5095_v30, %v5039_v35 }
 0x390   : > { %3479 = vmatpush3.bf16.msra.mxu1 %v3933_v50 }
 0x391   : > { %3744 = vmatprep.subr.bf16.mxu1 %v3934_v54 }
 0x392   : > { %3447 = vmatpush3.bf16.msra.mxu0 %v1273_v20 }
 0x393   : > { %3496 = vmatprep.subr.bf16.mxu0 %v3934_v54 }
 0x395   : > { %3449 = vmatmul.mubr.bf16.vlgmr.msra.gmra.mrb[16].mxu0 %v3919_v28 }
 0x396   : > { %3452 = vmatprep.mubr.bf16.mxu0 %v3920_v33  ;;  %3497 = vmatpush3.bf16.msra.mxu0 %v3934_v54 }
 0x397   : > { %3498 = vmatprep.subr.bf16.mxu0 %v3935_v57 }
 0x39a   : > { %3499 = vmatpush3.bf16.msra.mxu0 %v3935_v57 }
 0x39b   : > { %3500 = vmatprep.subr.bf16.mxu0 %v3936_v63 }
 0x39d   : > { %3453 = vmatmul.mubr.bf16.gmra.mrb[20].mxu0 %v3921_v51 }
 0x39e   : > { %3456 = vmatprep.mubr.bf16.mxu0 %v3922_v37  ;;  %3501 = vmatpush3.bf16.msra.mxu0 %v3936_v63 }
 0x39f   : > { %3502 = vmatprep.subr.bf16.mxu0 %v5080_v4 }
 0x3a2   : > { %3503 = vmatpush3.bf16.msra.mxu0 %v5080_v4 }
 0x3a3   : > { %3504 = vmatprep.subr.bf16.mxu0 %v5084_v31 }
 0x3a5   : > { %3457 = vmatmul.mubr.bf16.gmra.mrb[24].mxu0 %v3923_v6 }
 0x3a6   : > { %3460 = vmatprep.mubr.bf16.mxu0 %v3924_v48  ;;  %3505 = vmatpush3.bf16.msra.mxu0 %v5084_v31 }
 0x3a7   : > { %3506 = vmatprep.subr.bf16.mxu0 %v5089_v62 }
 0x3aa   : > { %3507 = vmatpush3.bf16.msra.mxu0 %v5089_v62 }
 0x3ad   : > { %3461 = vmatmul.mubr.bf16.gmra.mrb[28].mxu0 %v3925_v53 }
 0x468   : > { %v3450_v21 = vpop.f32.mrb[16].mxu0 }
 0x469   : > { %v1440_v29 = vadd.f32 %v3450_v21, %v1424_v0  ;;  %v1356_v12 = vpop.f32.mrb[17].mxu0  ;;  %v1427_v0 = vmul.f32 %v5095_v30, %v5005_v59  ;;  %v1433_v59 = vmul.f32 %v5095_v30, %v5021_v16 }
 0x46a   : > { %v1438_v34 = vadd.f32 %v1422_v10, %v1356_v12  ;;  %v3451_v20 = vpop.f32.mrb[18].mxu0 }
 0x46b   : > { %v1441_v28 = vadd.f32 %v3451_v20, %v1425_v32  ;;  %v1359_v33 = vpop.f32.mrb[19].mxu0 }
 0x46c   : > { %v1439_v51 = vadd.f32 %v1423_v52, %v1359_v33 }
 0x46d   : > { %v1455_v37 = vpack.c.bf16 %v1441_v28, %v1440_v29 }
 0x46e   : > { %v1454_v6 = vpack.c.bf16 %v1439_v51, %v1438_v34 }
 0x470   : > { %v3454_v48 = vpop.f32.mrb[20].mxu0  ;;  %3480 = vmatprep.mubr.bf16.mxu1 %v1454_v6 }
 0x471   : > { %v1444_v53 = vadd.f32 %v3454_v48, %v1428_v41  ;;  %v1372_v42 = vpop.f32.mrb[21].mxu0  ;;  %3481 = vmatmul.mubr.bf16.vlgmr.msra.gmra.mrb[16].mxu1 %v1455_v37  ;;  %v1437_v41 = vmul.f32 %v5095_v30, %v5041_v36  ;;  %v3940_v36 = vld [vmem:[%s4888_s17 + $0x30] sm:$0xff]  }
 0x472   : > { %v1442_v45 = vadd.f32 %v1426_v44, %v1372_v42  ;;  %v3455_v50 = vpop.f32.mrb[22].mxu0  ;;  %3752 = vmatpush3.bf16.msra.mxu1 %v3934_v54  ;;  %3508 = vmatprep.subr.bf16.mxu0 %v3940_v36 }
 0x473   : > { %v1445_v21 = vadd.f32 %v3455_v50, %v1429_v49  ;;  %v1375_v10 = vpop.f32.mrb[23].mxu0  ;;  %3745 = vmatprep.subr.bf16.mxu1 %v3935_v57  ;;  %3509 = vmatpush3.bf16.msra.mxu0 %v3940_v36 }
 0x474   : > { %v1443_v55 = vadd.f32 %v1427_v0, %v1375_v10 }
 0x475   : > { %v1457_v29 = vpack.c.bf16 %v1445_v21, %v1444_v53 }
 0x476   : > { %v1456_v12 = vpack.c.bf16 %v1443_v55, %v1442_v45  ;;  %3753 = vmatpush3.bf16.msra.mxu1 %v3935_v57  ;;  %v1431_v57 = vmul.f32 %v5095_v30, %v5025_v25  ;;  %v1434_v25 = vmul.f32 %v5095_v30, %v5043_v38 }
 0x477   : > { %3746 = vmatprep.subr.bf16.mxu1 %v3936_v63 }
 0x478   : > { %v3458_v32 = vpop.f32.mrb[24].mxu0  ;;  %3484 = vmatprep.mubr.bf16.mxu1 %v1456_v12 }
 0x479   : > { %v1448_v34 = vadd.f32 %v3458_v32, %v1432_v58  ;;  %v1388_v20 = vpop.f32.mrb[25].mxu0  ;;  %3485 = vmatmul.mubr.bf16.gmra.mrb[20].mxu1 %v1457_v29 }
 0x47a   : > { %v1446_v54 = vadd.f32 %v1430_v56, %v1388_v20  ;;  %v3459_v52 = vpop.f32.mrb[26].mxu0  ;;  %3754 = vmatpush3.bf16.msra.mxu1 %v3936_v63 }
 0x47b   : > { %v1449_v28 = vadd.f32 %v3459_v52, %v1433_v59  ;;  %v1391_v13 = vpop.f32.mrb[27].mxu0  ;;  %3747 = vmatprep.subr.bf16.mxu1 %v5080_v4 }
 0x47c   : > { %v1447_v33 = vadd.f32 %v1431_v57, %v1391_v13 }
 0x47d   : > { %v1459_v51 = vpack.c.bf16 %v1449_v28, %v1448_v34 }
 0x47e   : > { %v1458_v37 = vpack.c.bf16 %v1447_v33, %v1446_v54  ;;  %3755 = vmatpush3.bf16.msra.mxu1 %v5080_v4  ;;  %v1435_v4 = vmul.f32 %v5095_v30, %v5045_v39  ;;  %v3941_v39 = vld [vmem:[%s4888_s17 + $0x38] sm:$0xff]  }
 0x47f   : > { %3748 = vmatprep.subr.bf16.mxu1 %v5084_v31  ;;  %3510 = vmatprep.subr.bf16.mxu0 %v3941_v39 }
 0x480   : > { %v3462_v16 = vpop.f32.mrb[28].mxu0  ;;  %3488 = vmatprep.mubr.bf16.mxu1 %v1458_v37  ;;  %3511 = vmatpush3.bf16.msra.mxu0 %v3941_v39 }
 0x481   : > { %v1452_v63 = vadd.f32 %v3462_v16, %v1436_v24  ;;  %v1404_v6 = vpop.f32.mrb[29].mxu0  ;;  %3489 = vmatmul.mubr.bf16.gmra.mrb[24].mxu1 %v1459_v51  ;;  %3528 = vmatprep.subr.bf16.mxu0 (!%p3107_p12), %v4994_v47 }
 0x482   : > { %v1450_v48 = vadd.f32 %v1434_v25, %v1404_v6  ;;  %v3463_v44 = vpop.f32.mrb[30].mxu0  ;;  %3756 = vmatpush3.bf16.msra.mxu1 %v5084_v31  ;;  %v3089_v31 = vld [vmem:[%s5436_s30] ss:$0 sm:$0xff] }
 0x483   : > { %v1453_v35 = vadd.f32 %v3463_v44, %v1437_v41  ;;  %v1407_v53 = vpop.f32.mrb[31].mxu0  ;;  %3749 = vmatprep.subr.bf16.mxu1 %v5089_v62 }
 0x484   : > { %v1451_v38 = vadd.f32 %v1435_v4, %v1407_v53 }
 0x485   : > { %v1461_v42 = vpack.c.bf16 %v1453_v35, %v1452_v63 }
 0x486   : > { %v1460_v49 = vpack.c.bf16 %v1451_v38, %v1450_v48  ;;  %3757 = vmatpush3.bf16.msra.mxu1 %v5089_v62 }
 0x487   : > { %3750 = vmatprep.subr.bf16.mxu1 %v3940_v36 }
 0x488   : > { %3492 = vmatprep.mubr.bf16.mxu1 %v1460_v49 }
 0x489   : > { %3493 = vmatmul.mubr.bf16.gmra.mrb[28].mxu1 %v1461_v42 }
 0x48a   : > { %3758 = vmatpush3.bf16.msra.mxu1 %v3940_v36 }
 0x48b   : > { %3751 = vmatprep.subr.bf16.mxu1 %v3941_v39 }
 0x48e   : > { %3759 = vmatpush3.bf16.msra.mxu1 %v3941_v39 }
 0x544   : > { %v3482_v30 = vpop.f32.mrb[16].mxu1 }
 0x545   : > { %v1576_v45 = vadd.f32 %v3482_v30, %v3089_v31  ;;  %v1567_v62 = vpop.f32.mrb[17].mxu1 }
 0x546   : > { %v1568_v50 = vadd.f32 %v3089_v31, %v1567_v62  ;;  %v3483_v0 = vpop.f32.mrb[18].mxu1 }
 0x547   : > { %v1579_v21 = vadd.f32 %v3483_v0, %v3089_v31  ;;  %v1570_v10 = vpop.f32.mrb[19].mxu1  ;;  %v1632_v29 = vmax.f32 %v1576_v45, 0.0 }
 0x548   : > { %v1571_v55 = vadd.f32 %v3089_v31, %v1570_v10  ;;  %v1630_v58 = vmax.f32 %v1568_v50, 0.0 }
 0x549   : > { %v1633_v12 = vmax.f32 %v1579_v21, 0.0 }
 0x54a   : > { %v1631_v32 = vmax.f32 %v1571_v55, 0.0 }
 0x54b   : > { %v1647_v56 = vpack.c.bf16 %v1633_v12, %v1632_v29 }
 0x54c   : > { %v1646_v34 = vpack.c.bf16 %v1631_v32, %v1630_v58  ;;  %v3486_v20 = vpop.f32.mrb[20].mxu1 }
 0x54d   : > { %v1592_v59 = vadd.f32 %v3486_v20, %v3089_v31  ;;  %v1583_v54 = vpop.f32.mrb[21].mxu1 }
 0x54e   : > { %v1584_v52 = vadd.f32 %v3089_v31, %v1583_v54  ;;  %v3487_v57 = vpop.f32.mrb[22].mxu1  ;;  %3512 = vmatprep.mubr.bf16.mxu0 %v1646_v34  ;;  %v3098_v54 = vld [vmem:[%s774_s8] ss:$0 sm:$0xff] }
 0x54f   : > { %v1595_v28 = vadd.f32 %v3487_v57, %v3089_v31  ;;  %v1586_v13 = vpop.f32.mrb[23].mxu1  ;;  %3513 = vmatmul.mubr.bf16.vlgmr.msra.gmra.mrb[32].mxu0 %v1647_v56  ;;  %v1636_v51 = vmax.f32 %v1592_v59, 0.0 }
 0x550   : > { %v1587_v33 = vadd.f32 %v3089_v31, %v1586_v13  ;;  %v1634_v24 = vmax.f32 %v1584_v52, 0.0  ;;  %3529 = vmatpush3.bf16.msra.mxu0 (!%p3107_p12), %v4994_v47 }
 0x551   : > { %v1637_v37 = vmax.f32 %v1595_v28, 0.0  ;;  %3530 = vmatprep.subr.bf16.mxu0 (!%p3107_p12), %v4990_v46 }
 0x552   : > { %v1635_v16 = vmax.f32 %v1587_v33, 0.0 }
 0x553   : > { %v1649_v25 = vpack.c.bf16 %v1637_v37, %v1636_v51 }
 0x554   : > { %v1648_v63 = vpack.c.bf16 %v1635_v16, %v1634_v24  ;;  %v3490_v6 = vpop.f32.mrb[24].mxu1  ;;  %3531 = vmatpush3.bf16.msra.mxu0 (!%p3107_p12), %v4990_v46  ;;  %v3953_v46 = vld [vmem:[%s4890_s1 + $0x18] sm:$0xff] (!%p3107_p12)  }
 0x555   : > { %v1608_v41 = vadd.f32 %v3490_v6, %v3089_v31  ;;  %v1599_v48 = vpop.f32.mrb[25].mxu1  ;;  %3532 = vmatprep.subr.bf16.mxu0 (!%p3107_p12), %v5014_v61 }
 0x556   : > { %v1600_v44 = vadd.f32 %v3089_v31, %v1599_v48  ;;  %v3491_v4 = vpop.f32.mrb[26].mxu1  ;;  %3516 = vmatprep.mubr.bf16.mxu0 %v1648_v63 }
 0x557   : > { %v1611_v35 = vadd.f32 %v3491_v4, %v3089_v31  ;;  %v1602_v53 = vpop.f32.mrb[27].mxu1  ;;  %3517 = vmatmul.mubr.bf16.gmra.mrb[36].mxu0 %v1649_v25  ;;  %v1640_v42 = vmax.f32 %v1608_v41, 0.0 }
 0x558   : > { %v1603_v38 = vadd.f32 %v3089_v31, %v1602_v53  ;;  %v1638_v36 = vmax.f32 %v1600_v44, 0.0  ;;  %3533 = vmatpush3.bf16.msra.mxu0 (!%p3107_p12), %v5014_v61  ;;  %v3955_v61 = vld [vmem:[%s4890_s1 + $0x28] sm:$0xff] (!%p3107_p12)  }
 0x559   : > { %v1641_v49 = vmax.f32 %v1611_v35, 0.0  ;;  %3534 = vmatprep.subr.bf16.mxu0 (!%p3107_p12), %v5009_v60 }
 0x55a   : > { %v1639_v39 = vmax.f32 %v1603_v38, 0.0 }
 0x55b   : > { %v1651_v30 = vpack.c.bf16 %v1641_v49, %v1640_v42 }
 0x55c   : > { %v1650_v45 = vpack.c.bf16 %v1639_v39, %v1638_v36  ;;  %v3494_v62 = vpop.f32.mrb[28].mxu1  ;;  %3535 = vmatpush3.bf16.msra.mxu0 (!%p3107_p12), %v5009_v60  ;;  %v3954_v60 = vld [vmem:[%s4890_s1 + $0x20] sm:$0xff] (!%p3107_p12)  }
 0x55d   : > { %v1624_v50 = vadd.f32 %v3494_v62, %v3089_v31  ;;  %v1615_v0 = vpop.f32.mrb[29].mxu1  ;;  %3536 = vmatprep.subr.bf16.mxu0 (!%p3107_p12), %v5034_v27 }
 0x55e   : > { %v1616_v21 = vadd.f32 %v3089_v31, %v1615_v0  ;;  %v3495_v10 = vpop.f32.mrb[30].mxu1  ;;  %3520 = vmatprep.mubr.bf16.mxu1 %v1650_v45 }
 0x55f   : > { %v1627_v55 = vadd.f32 %v3495_v10, %v3089_v31  ;;  %v1618_v29 = vpop.f32.mrb[31].mxu1  ;;  %3521 = vmatmul.mubr.bf16.vlgmr.msra.gmra.mrb[32].mxu1 %v1651_v30  ;;  %v1644_v58 = vmax.f32 %v1624_v50, 0.0 }
 0x560   : > { %v1619_v12 = vadd.f32 %v3089_v31, %v1618_v29  ;;  %v1642_v56 = vmax.f32 %v1616_v21, 0.0  ;;  %3537 = vmatpush3.bf16.msra.mxu0 (!%p3107_p12), %v5034_v27  ;;  %v3943_v27 = vld [vmem:[#allocation12 + $0x8] sm:$0xff] (!%p3107_p12)  }
 0x561   : > { %v1645_v32 = vmax.f32 %v1627_v55, 0.0  ;;  %3538 = vmatprep.subr.bf16.mxu0 (!%p3107_p12), %v5029_v26 }
 0x562   : > { %v1643_v34 = vmax.f32 %v1619_v12, 0.0 }
 0x563   : > { %v1653_v20 = vpack.c.bf16 %v1645_v32, %v1644_v58 }
 0x564   : > { %v1652_v59 = vpack.c.bf16 %v1643_v34, %v1642_v56  ;;  %3539 = vmatpush3.bf16.msra.mxu0 (!%p3107_p12), %v5029_v26  ;;  %v3945_v26 = vld [vmem:[#allocation12 + $0x18] sm:$0xff] (!%p3107_p12)  }
 0x565   : > { %3540 = vmatprep.subr.bf16.mxu0 (!%p3107_p12), %v5054_v43 }
 0x566   : > { %3524 = vmatprep.mubr.bf16.mxu1 %v1652_v59 }
 0x567   : > { %3525 = vmatmul.mubr.bf16.gmra.mrb[36].mxu1 %v1653_v20 }
 0x568   : > { %3541 = vmatpush3.bf16.msra.mxu0 (!%p3107_p12), %v5054_v43  ;;  %v3947_v43 = vld [vmem:[#allocation12 + $0x28] sm:$0xff] (!%p3107_p12)  }
 0x569   : > { %3542 = vmatprep.subr.bf16.mxu0 (!%p3107_p12), %v5049_v40 }
 0x56c   : > { %3543 = vmatpush3.bf16.msra.mxu0 (!%p3107_p12), %v5049_v40  ;;  %v3949_v40 = vld [vmem:[#allocation12 + $0x38] sm:$0xff] (!%p3107_p12)  }
 0x622   : > { %v3514_v52 = vpop.f32.mrb[32].mxu0 }
 0x623   : > { %v5147_v57 = vadd.f32 %v3514_v52, %v3098_v54  ;;  %v1759_v28 = vpop.f32.mrb[33].mxu0 }
 0x624   : > { %v5149_v13 = vadd.f32 %v3098_v54, %v1759_v28  ;;  %v3515_v31 = vpop.f32.mrb[34].mxu0 }
 0x625   : > { %v5151_v33 = vadd.f32 %v3515_v31, %v3098_v54  ;;  %v1762_v51 = vpop.f32.mrb[35].mxu0  ;;  %v1828_v58 = vmax.f32 (!%p3107_p12), %v5147_v57, 0.0 }
 0x626   : > { %v5153_v37 = vadd.f32 %v3098_v54, %v1762_v51  ;;  %v1826_v29 = vmax.f32 (!%p3107_p12), %v5149_v13, 0.0  ;;  %v3942_v51 = vld [vmem:[#allocation12] sm:$0xff] (!%p3107_p12)  }
 0x627   : > { %v1829_v32 = vmax.f32 (!%p3107_p12), %v5151_v33, 0.0  ;;  %1844 = vst [vmem:[#allocation2 + $0x10] sm:$0xff] (!%p3107_p12), %v1828_v58  ;;  %3544 = vmatprep.mubr.bf16.mxu0 (!%p3107_p12), %v3942_v51  ;;  %v3961_v58 = vld [vmem:[%s4892_s21 + $0x18] sm:$0xff] (!%p3107_p12)  }
 0x628   : > { %v1827_v12 = vmax.f32 (!%p3107_p12), %v5153_v37, 0.0  ;;  %1842 = vst [vmem:[#allocation2] sm:$0xff] (!%p3107_p12), %v1826_v29  ;;  %3545 = vmatmul.mubr.bf16.vlgmr.msra.gmra.mrb[0].mxu0 (!%p3107_p12), %v3943_v27  ;;  %v3959_v29 = vld [vmem:[%s4892_s21 + $0x8] sm:$0xff] (!%p3107_p12)  }
 0x629   : > { %1845 = vst [vmem:[#allocation2 + $0x18] sm:$0xff] (!%p3107_p12), %v1829_v32  ;;  %v3962_v32 = vld [vmem:[%s4892_s21 + $0x20] sm:$0xff] (!%p3107_p12)  }
 0x62a   : > { %v3518_v24 = vpop.f32.mrb[36].mxu0  ;;  %1843 = vst [vmem:[#allocation2 + $0x8] sm:$0xff] (!%p3107_p12), %v1827_v12  ;;  %v3960_v12 = vld [vmem:[%s4892_s21 + $0x10] sm:$0xff] (!%p3107_p12)  }
 0x62b   : > { %v5155_v16 = vadd.f32 %v3518_v24, %v3098_v54  ;;  %v1775_v25 = vpop.f32.mrb[37].mxu0 }
 0x62c   : > { %v5157_v63 = vadd.f32 %v3098_v54, %v1775_v25  ;;  %v3519_v6 = vpop.f32.mrb[38].mxu0 }
 0x62d   : > { %v5159_v41 = vadd.f32 %v3519_v6, %v3098_v54  ;;  %v1778_v48 = vpop.f32.mrb[39].mxu0  ;;  %v1832_v20 = vmax.f32 (!%p3107_p12), %v5155_v16, 0.0 }
 0x62e   : > { %v5161_v44 = vadd.f32 %v3098_v54, %v1778_v48  ;;  %v1830_v56 = vmax.f32 (!%p3107_p12), %v5157_v63, 0.0  ;;  %v3950_v48 = vld [vmem:[%s4890_s1] sm:$0xff] (!%p3107_p12)  }
 0x62f   : > { %v1833_v59 = vmax.f32 (!%p3107_p12), %v5159_v41, 0.0  ;;  %1848 = vst [vmem:[#allocation2 + $0x30] sm:$0xff] (!%p3107_p12), %v1832_v20  ;;  %3560 = vmatprep.subr.bf16.mxu1 (!%p3107_p12), %v3950_v48 }
 0x630   : > { %v1831_v34 = vmax.f32 (!%p3107_p12), %v5161_v44, 0.0  ;;  %1846 = vst [vmem:[#allocation2 + $0x20] sm:$0xff] (!%p3107_p12), %v1830_v56  ;;  %3561 = vmatpush3.bf16.msra.mxu1 (!%p3107_p12), %v3950_v48  ;;  %v3963_v56 = vld [vmem:[%s4892_s21 + $0x28] sm:$0xff] (!%p3107_p12)  }
 0x631   : > { %1849 = vst [vmem:[#allocation2 + $0x38] sm:$0xff] (!%p3107_p12), %v1833_v59 }
 0x632   : > { %v3522_v4 = vpop.f32.mrb[32].mxu1  ;;  %1847 = vst [vmem:[#allocation2 + $0x28] sm:$0xff] (!%p3107_p12), %v1831_v34 }
 0x633   : > { %v5163_v35 = vadd.f32 %v3522_v4, %v3098_v54  ;;  %v1791_v53 = vpop.f32.mrb[33].mxu1  ;;  %v3951_v4 = vld [vmem:[%s4890_s1 + $0x8] sm:$0xff] (!%p3107_p12)  }
 0x634   : > { %v5165_v38 = vadd.f32 %v3098_v54, %v1791_v53  ;;  %v3523_v42 = vpop.f32.mrb[34].mxu1  ;;  %3562 = vmatprep.subr.bf16.mxu1 (!%p3107_p12), %v3951_v4  ;;  %v3952_v53 = vld [vmem:[%s4890_s1 + $0x10] sm:$0xff] (!%p3107_p12)  }
 0x635   : > { %v5167_v49 = vadd.f32 %v3523_v42, %v3098_v54  ;;  %v1794_v36 = vpop.f32.mrb[35].mxu1  ;;  %v1836_v28 = vmax.f32 (!%p3107_p12), %v5163_v35, 0.0  ;;  %3563 = vmatpush3.bf16.msra.mxu1 (!%p3107_p12), %v3951_v4  ;;  %v3944_v42 = vld [vmem:[#allocation12 + $0x10] sm:$0xff] (!%p3107_p12)  }
 0x636   : > { %v5169_v39 = vadd.f32 %v3098_v54, %v1794_v36  ;;  %3564 = vmatprep.subr.bf16.mxu1 (!%p3107_p12), %v3952_v53  ;;  %3548 = vmatprep.mubr.bf16.mxu0 (!%p3107_p12), %v3944_v42  ;;  %v3946_v36 = vld [vmem:[#allocation12 + $0x20] sm:$0xff] (!%p3107_p12)  }
 0x637   : > { %v1837_v31 = vmax.f32 (!%p3107_p12), %v5167_v49, 0.0  ;;  %1852 = vst [vmem:[#allocation2 + $0x50] sm:$0xff] (!%p3107_p12), %v1836_v28  ;;  %3549 = vmatmul.mubr.bf16.gmra.mrb[4].mxu0 (!%p3107_p12), %v3945_v26 }
 0x638   : > { %1825 = sbr.rel (%p3107_p12) target bundleno = 2269 (0x8dd), region = 133  ;;  %v1835_v52 = vmax.f32 (!%p3107_p12), %v5169_v39, 0.0  ;;  %3552 = vmatprep.mubr.bf16.mxu0 (!%p3107_p12), %v3946_v36 }
 0x639   : > { %1853 = vst [vmem:[#allocation2 + $0x58] sm:$0xff] (!%p3107_p12), %v1837_v31  ;;  %3565 = vmatpush3.bf16.msra.mxu1 (!%p3107_p12), %v3952_v53 }
 0x63a   : > { %v3526_v30 = vpop.f32.mrb[36].mxu1  ;;  %1851 = vst [vmem:[#allocation2 + $0x48] sm:$0xff] (!%p3107_p12), %v1835_v52  ;;  %3566 = vmatprep.subr.bf16.mxu1 (!%p3107_p12), %v3953_v46 }
 0x63b   : > { %v5171_v45 = vadd.f32 %v3526_v30, %v3098_v54  ;;  %v1807_v62 = vpop.f32.mrb[37].mxu1  ;;  %v3948_v30 = vld [vmem:[#allocation12 + $0x30] sm:$0xff] (!%p3107_p12)  }
 0x63c   : > { %v5173_v50 = vadd.f32 %v3098_v54, %v1807_v62  ;;  %v3527_v0 = vpop.f32.mrb[38].mxu1  ;;  %v3956_v62 = vld [vmem:[%s4890_s1 + $0x30] sm:$0xff] (!%p3107_p12)  }
 0x63d   : > { %v5175_v21 = vadd.f32 %v3527_v0, %v3098_v54  ;;  %v1810_v10 = vpop.f32.mrb[39].mxu1  ;;  %v1840_v47 = vmax.f32 (!%p3107_p12), %v5171_v45, 0.0  ;;  %3567 = vmatpush3.bf16.msra.mxu1 (!%p3107_p12), %v3953_v46  ;;  %v3957_v0 = vld [vmem:[%s4890_s1 + $0x38] sm:$0xff] (!%p3107_p12)  }
 0x63e   : > { %v5177_v55 = vadd.f32 %v3098_v54, %v1810_v10  ;;  %v1834_v54 = vmax.f32 (!%p3107_p12), %v5165_v38, 0.0  ;;  %v1838_v24 = vmax.f32 (!%p3107_p12), %v5173_v50, 0.0  ;;  %3568 = vmatprep.subr.bf16.mxu1 (!%p3107_p12), %v3954_v60  ;;  %v3958_v10 = vld [vmem:[%s4892_s21] sm:$0xff] (!%p3107_p12)  }
 0x63f   : > { %v1841_v6 = vmax.f32 %v5175_v21, 0.0  ;;  %1856 = vst [vmem:[#allocation2 + $0x70] sm:$0xff] %v1840_v47  ;;  %3553 = vmatmul.mubr.bf16.gmra.mrb[8].mxu0 %v3947_v43  ;;  %3592 = vmatprep.subr.bf16.mxu0 %v3958_v10 }
 0x640   : > { %v1839_v25 = vmax.f32 %v5177_v55, 0.0  ;;  %1850 = vst [vmem:[#allocation2 + $0x40] sm:$0xff] %v1834_v54  ;;  %1854 = vst [vmem:[#allocation2 + $0x60] sm:$0xff] %v1838_v24  ;;  %3556 = vmatprep.mubr.bf16.mxu0 %v3948_v30  ;;  %3593 = vmatpush3.bf16.msra.mxu0 %v3958_v10 }
 0x641   : > { %1857 = vst [vmem:[#allocation2 + $0x78] sm:$0xff] %v1841_v6  ;;  %3569 = vmatpush3.bf16.msra.mxu1 %v3954_v60  ;;  %3594 = vmatprep.subr.bf16.mxu0 %v3959_v29 }
 0x642   : > { %1855 = vst [vmem:[#allocation2 + $0x68] sm:$0xff] %v1839_v25  ;;  %3570 = vmatprep.subr.bf16.mxu1 %v3955_v61 }
 0x644   : > { %3595 = vmatpush3.bf16.msra.mxu0 %v3959_v29 }
 0x645   : > { %3571 = vmatpush3.bf16.msra.mxu1 %v3955_v61  ;;  %3596 = vmatprep.subr.bf16.mxu0 %v3960_v12 }
 0x646   : > { %3572 = vmatprep.subr.bf16.mxu1 %v3956_v62 }
 0x647   : > { %3557 = vmatmul.mubr.bf16.gmra.mrb[12].mxu0 %v3949_v40 }
 0x648   : > { %3597 = vmatpush3.bf16.msra.mxu0 %v3960_v12 }
 0x649   : > { %3573 = vmatpush3.bf16.msra.mxu1 %v3956_v62  ;;  %3598 = vmatprep.subr.bf16.mxu0 %v3961_v58 }
 0x64a   : > { %3574 = vmatprep.subr.bf16.mxu1 %v3957_v0 }
 0x64c   : > { %3599 = vmatpush3.bf16.msra.mxu0 %v3961_v58 }
 0x64d   : > { %3575 = vmatpush3.bf16.msra.mxu1 %v3957_v0  ;;  %3600 = vmatprep.subr.bf16.mxu0 %v3962_v32 }
 0x64e   : > { %3760 = vmatprep.subr.bf16.mxu1 %v3958_v10 }
 0x650   : > { %3601 = vmatpush3.bf16.msra.mxu0 %v3962_v32 }
 0x651   : > { %3602 = vmatprep.subr.bf16.mxu0 %v3963_v56 }
 0x654   : > { %3603 = vmatpush3.bf16.msra.mxu0 %v3963_v56 }
 0x6fb   : > { %v3546_v34 = vpop.f32.mrb[0].mxu0 }
 0x6fc   : > { %v1956_v20 = vpop.f32.mrb[1].mxu0  ;;  %v1965_v54 = vadd.f32 %v3546_v34, %v4936_v3 }
 0x6fd   : > { %v3547_v59 = vpop.f32.mrb[2].mxu0  ;;  %v1957_v31 = vadd.f32 %v1956_v20, %v4932_v1 }
 0x6fe   : > { %v1968_v52 = vadd.f32 %v3547_v59, %v4940_v5  ;;  %v1959_v28 = vpop.f32.mrb[3].mxu0 }
 0x6ff   : > { %v1960_v51 = vadd.f32 %v1959_v28, %v4934_v2 }
 0x700   : > { %v2020_v24 = vpack.c.bf16 %v1968_v52, %v1965_v54 }
 0x701   : > { %v2019_v25 = vpack.c.bf16 %v1960_v51, %v1957_v31 }
 0x703   : > { %3576 = vmatprep.mubr.bf16.mxu1 %v2019_v25 }
 0x704   : > { %3577 = vmatmul.mubr.bf16.vlgmr.msra.gmra.mrb[0].mxu1 %v2020_v24 }
 0x705   : > { %3768 = vmatpush3.bf16.msra.mxu1 %v3958_v10 }
 0x706   : > { %3761 = vmatprep.subr.bf16.mxu1 %v3959_v29 }
 0x709   : > { %3769 = vmatpush3.bf16.msra.mxu1 %v3959_v29 }
 0x70a   : > { %v3550_v47 = vpop.f32.mrb[4].mxu0  ;;  %3762 = vmatprep.subr.bf16.mxu1 %v3960_v12 }
 0x70b   : > { %v1972_v6 = vpop.f32.mrb[5].mxu0  ;;  %v1981_v4 = vadd.f32 %v3550_v47, %v4948_v9 }
 0x70c   : > { %v3551_v48 = vpop.f32.mrb[6].mxu0  ;;  %v1973_v5 = vadd.f32 %v1972_v6, %v4944_v7 }
 0x70d   : > { %v1984_v53 = vadd.f32 %v3551_v48, %v4952_v11  ;;  %v1975_v3 = vpop.f32.mrb[7].mxu0  ;;  %3770 = vmatpush3.bf16.msra.mxu1 %v3960_v12  ;;  %v3964_v12 = vld [vmem:[%s4892_s21 + $0x30] sm:$0xff]  }
 0x70e   : > { %v1976_v1 = vadd.f32 %v1975_v3, %v4946_v8  ;;  %3763 = vmatprep.subr.bf16.mxu1 %v3961_v58  ;;  %3604 = vmatprep.subr.bf16.mxu0 %v3964_v12 }
 0x70f   : > { %v2022_v46 = vpack.c.bf16 %v1984_v53, %v1981_v4  ;;  %3605 = vmatpush3.bf16.msra.mxu0 %v3964_v12 }
 0x710   : > { %v2021_v2 = vpack.c.bf16 %v1976_v1, %v1973_v5 }
 0x711   : > { %3771 = vmatpush3.bf16.msra.mxu1 %v3961_v58 }
 0x712   : > { %v3554_v60 = vpop.f32.mrb[8].mxu0  ;;  %3580 = vmatprep.mubr.bf16.mxu1 %v2021_v2  ;;  %3764 = vmatprep.subr.bf16.mxu1 %v3962_v32 }
 0x713   : > { %v1988_v61 = vpop.f32.mrb[9].mxu0  ;;  %3581 = vmatmul.mubr.bf16.gmra.mrb[4].mxu1 %v2022_v46  ;;  %v1997_v9 = vadd.f32 %v3554_v60, %v4962_v17 }
 0x714   : > { %v3555_v27 = vpop.f32.mrb[10].mxu0  ;;  %v1989_v7 = vadd.f32 %v1988_v61, %v4956_v14 }
 0x715   : > { %v2000_v11 = vadd.f32 %v3555_v27, %v4964_v18  ;;  %v1991_v42 = vpop.f32.mrb[11].mxu0  ;;  %3772 = vmatpush3.bf16.msra.mxu1 %v3962_v32 }
 0x716   : > { %v1992_v8 = vadd.f32 %v1991_v42, %v4958_v15  ;;  %3765 = vmatprep.subr.bf16.mxu1 %v3963_v56  ;;  %v5438_v15 = vld [vmem:[#allocation40_spill] sm:$0xff] }
 0x717   : > { %v2024_v26 = vpack.c.bf16 %v2000_v11, %v1997_v9 }
 0x718   : > { %v2023_v36 = vpack.c.bf16 %v1992_v8, %v1989_v7 }
 0x719   : > { %3773 = vmatpush3.bf16.msra.mxu1 %v3963_v56 }
 0x71a   : > { %v3558_v43 = vpop.f32.mrb[12].mxu0  ;;  %3584 = vmatprep.mubr.bf16.mxu1 %v2023_v36  ;;  %3766 = vmatprep.subr.bf16.mxu1 %v3964_v12 }
 0x71b   : > { %v2004_v30 = vpop.f32.mrb[13].mxu0  ;;  %3585 = vmatmul.mubr.bf16.gmra.mrb[8].mxu1 %v2024_v26  ;;  %v2013_v17 = vadd.f32 %v3558_v43, %v4972_v22  ;;  %v3965_v22 = vld [vmem:[%s4892_s21 + $0x38] sm:$0xff]  }
 0x71c   : > { %v3559_v40 = vpop.f32.mrb[14].mxu0  ;;  %v2005_v14 = vadd.f32 %v2004_v30, %v4966_v19  ;;  %3606 = vmatprep.subr.bf16.mxu0 %v3965_v22  ;;  %v3116_v19 = vld [vmem:[%s777_s16] ss:$0 sm:$0xff] }
 0x71d   : > { %v2016_v18 = vadd.f32 %v3559_v40, %v4974_v23  ;;  %v2007_v62 = vpop.f32.mrb[15].mxu0  ;;  %3774 = vmatpush3.bf16.msra.mxu1 %v3964_v12  ;;  %3607 = vmatpush3.bf16.msra.mxu0 %v3965_v22 }
 0x71e   : > { %v2008_v0 = vadd.f32 %v2007_v62, %v5438_v15  ;;  %3767 = vmatprep.subr.bf16.mxu1 %v3965_v22 }
 0x71f   : > { %v2026_v10 = vpack.c.bf16 %v2016_v18, %v2013_v17 }
 0x720   : > { %v2025_v29 = vpack.c.bf16 %v2008_v0, %v2005_v14 }
 0x721   : > { %3775 = vmatpush3.bf16.msra.mxu1 %v3965_v22 }
 0x722   : > { %3588 = vmatprep.mubr.bf16.mxu1 %v2025_v29 }
 0x723   : > { %3589 = vmatmul.mubr.bf16.gmra.mrb[12].mxu1 %v2026_v10 }
 0x7d7   : > { %v3578_v23 = vpop.f32.mrb[0].mxu1 }
 0x7d8   : > { %v2141_v58 = vadd.f32 %v3578_v23, %v3116_v19  ;;  %v2132_v32 = vpop.f32.mrb[1].mxu1 }
 0x7d9   : > { %v2133_v56 = vadd.f32 %v3116_v19, %v2132_v32  ;;  %v3579_v34 = vpop.f32.mrb[2].mxu1 }
 0x7da   : > { %v2144_v20 = vadd.f32 %v3579_v34, %v3116_v19  ;;  %v2135_v59 = vpop.f32.mrb[3].mxu1  ;;  %v2197_v52 = vmax.f32 %v2141_v58, 0.0 }
 0x7db   : > { %v2136_v54 = vadd.f32 %v3116_v19, %v2135_v59  ;;  %v2195_v31 = vmax.f32 %v2133_v56, 0.0 }
 0x7dc   : > { %v2198_v28 = vmax.f32 %v2144_v20, 0.0 }
 0x7dd   : > { %v2196_v51 = vmax.f32 %v2136_v54, 0.0 }
 0x7de   : > { %v2212_v24 = vpack.c.bf16 %v2198_v28, %v2197_v52  ;;  %v3125_v28 = vld [vmem:[%s780_s26] ss:$0 sm:$0xff] }
 0x7df   : > { %v2211_v25 = vpack.c.bf16 %v2196_v51, %v2195_v31 }
 0x7e1   : > { %3608 = vmatprep.mubr.bf16.mxu0 %v2211_v25 }
 0x7e2   : > { %3609 = vmatmul.mubr.bf16.vlgmr.msra.gmra.mrb[16].mxu0 %v2212_v24 }
 0x7e6   : > { %v3582_v47 = vpop.f32.mrb[4].mxu1 }
 0x7e7   : > { %v2157_v6 = vadd.f32 %v3582_v47, %v3116_v19  ;;  %v2148_v48 = vpop.f32.mrb[5].mxu1 }
 0x7e8   : > { %v2149_v4 = vadd.f32 %v3116_v19, %v2148_v48  ;;  %v3583_v53 = vpop.f32.mrb[6].mxu1 }
 0x7e9   : > { %v2160_v3 = vadd.f32 %v3583_v53, %v3116_v19  ;;  %v2151_v5 = vpop.f32.mrb[7].mxu1  ;;  %v2201_v46 = vmax.f32 %v2157_v6, 0.0 }
 0x7ea   : > { %v2152_v1 = vadd.f32 %v3116_v19, %v2151_v5  ;;  %v2199_v60 = vmax.f32 %v2149_v4, 0.0 }
 0x7eb   : > { %v2202_v2 = vmax.f32 %v2160_v3, 0.0 }
 0x7ec   : > { %v2200_v61 = vmax.f32 %v2152_v1, 0.0 }
 0x7ed   : > { %v2214_v27 = vpack.c.bf16 %v2202_v2, %v2201_v46 }
 0x7ee   : > { %v2213_v9 = vpack.c.bf16 %v2200_v61, %v2199_v60  ;;  %v3586_v11 = vpop.f32.mrb[8].mxu1 }
 0x7ef   : > { %v2173_v42 = vadd.f32 %v3586_v11, %v3116_v19  ;;  %v2164_v7 = vpop.f32.mrb[9].mxu1 }
 0x7f0   : > { %v2165_v8 = vadd.f32 %v3116_v19, %v2164_v7  ;;  %v3587_v26 = vpop.f32.mrb[10].mxu1  ;;  %3612 = vmatprep.mubr.bf16.mxu0 %v2213_v9 }
 0x7f1   : > { %v2176_v36 = vadd.f32 %v3587_v26, %v3116_v19  ;;  %v2167_v43 = vpop.f32.mrb[11].mxu1  ;;  %3613 = vmatmul.mubr.bf16.gmra.mrb[20].mxu0 %v2214_v27  ;;  %v2205_v40 = vmax.f32 %v2173_v42, 0.0 }
 0x7f2   : > { %v2168_v30 = vadd.f32 %v3116_v19, %v2167_v43  ;;  %v2203_v18 = vmax.f32 %v2165_v8, 0.0 }
 0x7f3   : > { %v2206_v17 = vmax.f32 %v2176_v36, 0.0 }
 0x7f4   : > { %v2204_v62 = vmax.f32 %v2168_v30, 0.0 }
 0x7f5   : > { %v2216_v14 = vpack.c.bf16 %v2206_v17, %v2205_v40 }
 0x7f6   : > { %v2215_v15 = vpack.c.bf16 %v2204_v62, %v2203_v18  ;;  %v3590_v0 = vpop.f32.mrb[12].mxu1 }
 0x7f7   : > { %v2189_v10 = vadd.f32 %v3590_v0, %v3116_v19  ;;  %v2180_v29 = vpop.f32.mrb[13].mxu1 }
 0x7f8   : > { %v2181_v12 = vadd.f32 %v3116_v19, %v2180_v29  ;;  %v3591_v22 = vpop.f32.mrb[14].mxu1  ;;  %3616 = vmatprep.mubr.bf16.mxu1 %v2215_v15 }
 0x7f9   : > { %v2192_v23 = vadd.f32 %v3591_v22, %v3116_v19  ;;  %v2183_v58 = vpop.f32.mrb[15].mxu1  ;;  %3617 = vmatmul.mubr.bf16.vlgmr.msra.gmra.mrb[16].mxu1 %v2216_v14  ;;  %v2209_v56 = vmax.f32 %v2189_v10, 0.0 }
 0x7fa   : > { %v2184_v32 = vadd.f32 %v3116_v19, %v2183_v58  ;;  %v2207_v20 = vmax.f32 %v2181_v12, 0.0 }
 0x7fb   : > { %v2210_v34 = vmax.f32 %v2192_v23, 0.0 }
 0x7fc   : > { %v2208_v59 = vmax.f32 %v2184_v32, 0.0 }
 0x7fd   : > { %v2218_v54 = vpack.c.bf16 %v2210_v34, %v2209_v56 }
 0x7fe   : > { %v2217_v52 = vpack.c.bf16 %v2208_v59, %v2207_v20 }
 0x800   : > { %3620 = vmatprep.mubr.bf16.mxu1 %v2217_v52 }
 0x801   : > { %3621 = vmatmul.mubr.bf16.gmra.mrb[20].mxu1 %v2218_v54 }
 0x8b5   : > { %v3610_v31 = vpop.f32.mrb[16].mxu0 }
 0x8b6   : > { %v2333_v51 = vadd.f32 %v3610_v31, %v3125_v28  ;;  %v2324_v24 = vpop.f32.mrb[17].mxu0 }
 0x8b7   : > { %v2325_v25 = vadd.f32 %v3125_v28, %v2324_v24  ;;  %v3611_v47 = vpop.f32.mrb[18].mxu0 }
 0x8b8   : > { %v2389_v6 = vmax.f32 %v2333_v51, 0.0  ;;  %v2336_v19 = vadd.f32 %v3611_v47, %v3125_v28  ;;  %v2327_v48 = vpop.f32.mrb[19].mxu0 }
 0x8b9   : > { %v2387_v4 = vmax.f32 %v2325_v25, 0.0  ;;  %v2328_v53 = vadd.f32 %v3125_v28, %v2327_v48 }
 0x8ba   : > { %2405 = vst [vmem:[#allocation3 + $0x10] sm:$0xff] %v2389_v6  ;;  %v2390_v3 = vmax.f32 %v2336_v19, 0.0 }
 0x8bb   : > { %2403 = vst [vmem:[#allocation3] sm:$0xff] %v2387_v4  ;;  %v2388_v5 = vmax.f32 %v2328_v53, 0.0 }
 0x8bc   : > { %2406 = vst [vmem:[#allocation3 + $0x18] sm:$0xff] %v2390_v3 }
 0x8bd   : > { %2404 = vst [vmem:[#allocation3 + $0x8] sm:$0xff] %v2388_v5 }
 0x8c4   : > { %v3614_v1 = vpop.f32.mrb[20].mxu0 }
 0x8c5   : > { %v2349_v46 = vadd.f32 %v3614_v1, %v3125_v28  ;;  %v2340_v2 = vpop.f32.mrb[21].mxu0 }
 0x8c6   : > { %v2341_v60 = vadd.f32 %v3125_v28, %v2340_v2  ;;  %v3615_v61 = vpop.f32.mrb[22].mxu0 }
 0x8c7   : > { %v2393_v27 = vmax.f32 %v2349_v46, 0.0  ;;  %v2352_v9 = vadd.f32 %v3615_v61, %v3125_v28  ;;  %v2343_v11 = vpop.f32.mrb[23].mxu0 }
 0x8c8   : > { %v2391_v42 = vmax.f32 %v2341_v60, 0.0  ;;  %v2344_v7 = vadd.f32 %v3125_v28, %v2343_v11 }
 0x8c9   : > { %2409 = vst [vmem:[#allocation3 + $0x30] sm:$0xff] %v2393_v27  ;;  %v2394_v8 = vmax.f32 %v2352_v9, 0.0 }
 0x8ca   : > { %2407 = vst [vmem:[#allocation3 + $0x20] sm:$0xff] %v2391_v42  ;;  %v2392_v26 = vmax.f32 %v2344_v7, 0.0 }
 0x8cb   : > { %2410 = vst [vmem:[#allocation3 + $0x38] sm:$0xff] %v2394_v8 }
 0x8cc   : > { %2408 = vst [vmem:[#allocation3 + $0x28] sm:$0xff] %v2392_v26  ;;  %v3618_v36 = vpop.f32.mrb[16].mxu1 }
 0x8cd   : > { %v2365_v43 = vadd.f32 %v3618_v36, %v3125_v28  ;;  %v2356_v30 = vpop.f32.mrb[17].mxu1 }
 0x8ce   : > { %v2357_v40 = vadd.f32 %v3125_v28, %v2356_v30  ;;  %v3619_v17 = vpop.f32.mrb[18].mxu1 }
 0x8cf   : > { %v2397_v18 = vmax.f32 %v2365_v43, 0.0  ;;  %v2368_v62 = vadd.f32 %v3619_v17, %v3125_v28  ;;  %v2359_v14 = vpop.f32.mrb[19].mxu1 }
 0x8d0   : > { %v2395_v15 = vmax.f32 %v2357_v40, 0.0  ;;  %v2360_v0 = vadd.f32 %v3125_v28, %v2359_v14 }
 0x8d1   : > { %2413 = vst [vmem:[#allocation3 + $0x50] sm:$0xff] %v2397_v18  ;;  %v2398_v10 = vmax.f32 %v2368_v62, 0.0 }
 0x8d2   : > { %2411 = vst [vmem:[#allocation3 + $0x40] sm:$0xff] %v2395_v15  ;;  %v2396_v29 = vmax.f32 %v2360_v0, 0.0 }
 0x8d3   : > { %2414 = vst [vmem:[#allocation3 + $0x58] sm:$0xff] %v2398_v10 }
 0x8d4   : > { %2412 = vst [vmem:[#allocation3 + $0x48] sm:$0xff] %v2396_v29  ;;  %v3622_v12 = vpop.f32.mrb[20].mxu1 }
 0x8d5   : > { %v2381_v22 = vadd.f32 %v3622_v12, %v3125_v28  ;;  %v2372_v23 = vpop.f32.mrb[21].mxu1 }
 0x8d6   : > { %v2373_v58 = vadd.f32 %v3125_v28, %v2372_v23  ;;  %v3623_v32 = vpop.f32.mrb[22].mxu1 }
 0x8d7   : > { %v2401_v56 = vmax.f32 %v2381_v22, 0.0  ;;  %v2384_v34 = vadd.f32 %v3623_v32, %v3125_v28  ;;  %v2375_v20 = vpop.f32.mrb[23].mxu1 }
 0x8d8   : > { %v2399_v59 = vmax.f32 %v2373_v58, 0.0  ;;  %v2376_v54 = vadd.f32 %v3125_v28, %v2375_v20 }
 0x8d9   : > { %2417 = vst [vmem:[#allocation3 + $0x70] sm:$0xff] %v2401_v56  ;;  %v2402_v52 = vmax.f32 %v2384_v34, 0.0 }
 0x8da   : > { %2415 = vst [vmem:[#allocation3 + $0x60] sm:$0xff] %v2399_v59  ;;  %v2400_v31 = vmax.f32 %v2376_v54, 0.0 }
 0x8db   : > { %2418 = vst [vmem:[#allocation3 + $0x78] sm:$0xff] %v2402_v52 }
 0x8dc   : > { %2416 = vst [vmem:[#allocation3 + $0x68] sm:$0xff] %v2400_v31 }
 0x8dd PF: > { %s5441_s0 = sld [smem:[#allocation36_spill]] }
 0x8e3   : > { %p3134_p6 = scmp.ne.s32.totalorder %s5441_s0, 2 }
 0x8e4   : > { %v2439_v51 = vpack.c.bf16 (!%p3134_p6), %v5153_v37, %v5149_v13  ;;  %v2440_v24 = vpack.c.bf16 (!%p3134_p6), %v5151_v33, %v5147_v57  ;;  %v3966_v25 = vld [vmem:[#allocation12] sm:$0xff] (!%p3134_p6)   ;;  %v2441_v28 = vpack.c.bf16 (!%p3134_p6), %v5161_v44, %v5157_v63  ;;  %v2442_v47 = vpack.c.bf16 (!%p3134_p6), %v5159_v41, %v5155_v16  ;;  %v2593_v19 = vld [vmem:[#allocation19 + $0x8] sm:$0xff] (!%p3134_p6)  ;;  %v2594_v48 = vld [vmem:[#allocation19 + $0x10] sm:$0xff] (!%p3134_p6)  ;;  %s5442_s28 = sld [smem:[#allocation51_spill]] (!%p3134_p6) }
 0x8e5   : > { %2422 = sbr.rel (%p3134_p6) target bundleno = 2773 (0xad5), region = 137  ;;  %3640 = vmatprep.mubr.bf16.mxu0 (!%p3134_p6), %v3966_v25  ;;  %v2592_v6 = vld [vmem:[#allocation19] sm:$0xff] (!%p3134_p6)  ;;  %v2595_v37 = vld [vmem:[#allocation19 + $0x18] sm:$0xff] (!%p3134_p6)  ;;  %v2597_v33 = vld [vmem:[#allocation19 + $0x28] sm:$0xff] (!%p3134_p6)  ;;  %v2443_v53 = vpack.c.bf16 (!%p3134_p6), %v5169_v39, %v5165_v38  ;;  %v2444_v16 = vpack.c.bf16 (!%p3134_p6), %v5167_v49, %v5163_v35  ;;  %v2445_v38 = vpack.c.bf16 (!%p3134_p6), %v5177_v55, %v5173_v50  ;;  %v2446_v35 = vpack.c.bf16 (!%p3134_p6), %v5175_v21, %v5171_v45 }
 0x8e6   : > { %3624 = vmatprep.subr.bf16.mxu0 (!%p3134_p6), %v2439_v51  ;;  %v3712_v13 = vpack.c.bf16 (!%p3134_p6), %v2593_v19, %v2592_v6  ;;  %v3716_v4 = vpack.c.bf16 (!%p3134_p6), %v2595_v37, %v2594_v48  ;;  %v2596_v57 = vld [vmem:[#allocation19 + $0x20] sm:$0xff] (!%p3134_p6)  ;;  %v2598_v44 = vld [vmem:[#allocation19 + $0x30] sm:$0xff] (!%p3134_p6)  ;;  %v2599_v3 = vld [vmem:[#allocation19 + $0x38] sm:$0xff] (!%p3134_p6) }
 0x8e7   : > { %3625 = vmatpush3.bf16.msra.mxu0 (!%p3134_p6), %v2439_v51  ;;  %v3720_v63 = vpack.c.bf16 (!%p3134_p6), %v2597_v33, %v2596_v57  ;;  %v3724_v41 = vpack.c.bf16 (!%p3134_p6), %v2599_v3, %v2598_v44  ;;  %v2600_v5 = vld [vmem:[#allocation19 + $0x40] sm:$0xff] (!%p3134_p6)  ;;  %v2601_v1 = vld [vmem:[#allocation19 + $0x48] sm:$0xff] (!%p3134_p6)  ;;  %v2602_v46 = vld [vmem:[#allocation19 + $0x50] sm:$0xff] (!%p3134_p6) }
 0x8e8   : > { %3626 = vmatprep.subr.bf16.mxu0 (!%p3134_p6), %v2440_v24  ;;  %3713 = vmatprep.subr.bf16.mxu1 (!%p3134_p6), %v3712_v13  ;;  %v3728_v39 = vpack.c.bf16 (!%p3134_p6), %v2601_v1, %v2600_v5  ;;  %v2603_v2 = vld [vmem:[#allocation19 + $0x58] sm:$0xff] (!%p3134_p6)  ;;  %v2604_v60 = vld [vmem:[#allocation19 + $0x60] sm:$0xff] (!%p3134_p6)  ;;  %v2605_v61 = vld [vmem:[#allocation19 + $0x68] sm:$0xff] (!%p3134_p6) }
 0x8e9   : > { %3715 = vmatpush3.bf16.msra.mxu1 (!%p3134_p6), %v3712_v13  ;;  %v3732_v49 = vpack.c.bf16 (!%p3134_p6), %v2603_v2, %v2602_v46  ;;  %v3736_v50 = vpack.c.bf16 (!%p3134_p6), %v2605_v61, %v2604_v60  ;;  %v3967_v55 = vld [vmem:[#allocation12 + $0x8] sm:$0xff] (!%p3134_p6)   ;;  %v3968_v27 = vld [vmem:[#allocation12 + $0x10] sm:$0xff] (!%p3134_p6)   ;;  %v3969_v9 = vld [vmem:[#allocation12 + $0x18] sm:$0xff] (!%p3134_p6)  }
 0x8ea   : > { %3717 = vmatprep.subr.bf16.mxu1 (!%p3134_p6), %v3716_v4  ;;  %v3970_v45 = vld [vmem:[#allocation12 + $0x20] sm:$0xff] (!%p3134_p6)   ;;  %v3971_v21 = vld [vmem:[#allocation12 + $0x28] sm:$0xff] (!%p3134_p6)   ;;  %v3972_v11 = vld [vmem:[#allocation12 + $0x30] sm:$0xff] (!%p3134_p6)  }
 0x8eb   : > { %3627 = vmatpush3.bf16.msra.mxu0 (!%p3134_p6), %v2440_v24  ;;  %v3973_v42 = vld [vmem:[#allocation12 + $0x38] sm:$0xff] (!%p3134_p6)   ;;  %v2606_v7 = vld [vmem:[#allocation19 + $0x70] sm:$0xff] (!%p3134_p6)  ;;  %v5274_v32 = vld [vmem:[%s5442_s28] ss:$0 sm:$0xff] (!%p3134_p6) }
 0x8ec   : > { %3628 = vmatprep.subr.bf16.mxu0 %v2441_v28  ;;  %v2607_v8 = vld [vmem:[#allocation19 + $0x78] sm:$0xff] }
 0x8ed   : > { %3719 = vmatpush3.bf16.msra.mxu1 %v3716_v4  ;;  %v3740_v26 = vpack.c.bf16 %v2607_v8, %v2606_v7 }
 0x8ee   : > { %3721 = vmatprep.subr.bf16.mxu1 %v3720_v63 }
 0x8ef   : > { %3629 = vmatpush3.bf16.msra.mxu0 %v2441_v28 }
 0x8f0   : > { %3630 = vmatprep.subr.bf16.mxu0 %v2442_v47 }
 0x8f1   : > { %3723 = vmatpush3.bf16.msra.mxu1 %v3720_v63 }
 0x8f2   : > { %3725 = vmatprep.subr.bf16.mxu1 %v3724_v41 }
 0x8f3   : > { %3631 = vmatpush3.bf16.msra.mxu0 %v2442_v47 }
 0x8f4   : > { %3632 = vmatprep.subr.bf16.mxu0 %v2443_v53 }
 0x8f5   : > { %3727 = vmatpush3.bf16.msra.mxu1 %v3724_v41 }
 0x8f6   : > { %3729 = vmatprep.subr.bf16.mxu1 %v3728_v39 }
 0x8f7   : > { %3633 = vmatpush3.bf16.msra.mxu0 %v2443_v53 }
 0x8f8   : > { %3634 = vmatprep.subr.bf16.mxu0 %v2444_v16 }
 0x8f9   : > { %3731 = vmatpush3.bf16.msra.mxu1 %v3728_v39 }
 0x8fa   : > { %3733 = vmatprep.subr.bf16.mxu1 %v3732_v49 }
 0x8fb   : > { %3635 = vmatpush3.bf16.msra.mxu0 %v2444_v16 }
 0x8fc   : > { %3636 = vmatprep.subr.bf16.mxu0 %v2445_v38 }
 0x8fd   : > { %3735 = vmatpush3.bf16.msra.mxu1 %v3732_v49 }
 0x8fe   : > { %3737 = vmatprep.subr.bf16.mxu1 %v3736_v50 }
 0x8ff   : > { %3637 = vmatpush3.bf16.msra.mxu0 %v2445_v38 }
 0x900   : > { %3638 = vmatprep.subr.bf16.mxu0 %v2446_v35 }
 0x901   : > { %3739 = vmatpush3.bf16.msra.mxu1 %v3736_v50 }
 0x902   : > { %3741 = vmatprep.subr.bf16.mxu1 %v3740_v26 }
 0x903   : > { %3639 = vmatpush3.bf16.msra.mxu0 %v2446_v35 }
 0x905   : > { %3743 = vmatpush3.bf16.msra.mxu1 %v3740_v26 }
 0x906   : > { %3641 = vmatmul.mubr.bf16.vlgmr.msra.gmra.mrb[0].mxu0 %v3967_v55 }
 0x907   : > { %3644 = vmatprep.mubr.bf16.mxu0 %v3968_v27 }
 0x90e   : > { %3645 = vmatmul.mubr.bf16.gmra.mrb[4].mxu0 %v3969_v9 }
 0x90f   : > { %3648 = vmatprep.mubr.bf16.mxu0 %v3970_v45 }
 0x916   : > { %3649 = vmatmul.mubr.bf16.gmra.mrb[8].mxu0 %v3971_v21 }
 0x917   : > { %3652 = vmatprep.mubr.bf16.mxu0 %v3972_v11 }
 0x91e   : > { %3653 = vmatmul.mubr.bf16.gmra.mrb[12].mxu0 %v3973_v42 }
 0x9d9   : > { %v3642_v36 = vpop.f32.mrb[0].mxu0 }
 0x9da   : > { %v2529_v43 = vpop.f32.mrb[1].mxu0 }
 0x9db   : > { %v3643_v30 = vpop.f32.mrb[2].mxu0  ;;  %3688 = vmatprep.mubr.f32.mxu1 %v2529_v43 }
 0x9dc   : > { %v2532_v40 = vpop.f32.mrb[3].mxu0 }
 0x9dd   : > { %3689 = vmatmul.mubr.f32.vlgmr.msra.gmra.mrb[0].mxu1 %v2532_v40 }
 0x9de   : > { %3691 = vmatprep.mubr.f32.mxu1 %v3642_v36 }
 0x9e1   : > { %v3646_v17 = vpop.f32.mrb[4].mxu0  ;;  %3692 = vmatmul.mubr.f32.gmra.mrb[2].mxu1 %v3643_v30 }
 0x9e2   : > { %v2545_v18 = vpop.f32.mrb[5].mxu0 }
 0x9e3   : > { %v3647_v62 = vpop.f32.mrb[6].mxu0  ;;  %3694 = vmatprep.mubr.f32.mxu1 %v2545_v18 }
 0x9e4   : > { %v2548_v14 = vpop.f32.mrb[7].mxu0 }
 0x9e5   : > { %3695 = vmatmul.mubr.f32.gmra.mrb[4].mxu1 %v2548_v14 }
 0x9e6   : > { %3697 = vmatprep.mubr.f32.mxu1 %v3646_v17 }
 0x9e9   : > { %v3650_v15 = vpop.f32.mrb[8].mxu0  ;;  %3698 = vmatmul.mubr.f32.gmra.mrb[6].mxu1 %v3647_v62 }
 0x9ea   : > { %v2561_v0 = vpop.f32.mrb[9].mxu0 }
 0x9eb   : > { %v3651_v10 = vpop.f32.mrb[10].mxu0  ;;  %3700 = vmatprep.mubr.f32.mxu1 %v2561_v0 }
 0x9ec   : > { %v2564_v29 = vpop.f32.mrb[11].mxu0 }
 0x9ed   : > { %3701 = vmatmul.mubr.f32.gmra.mrb[8].mxu1 %v2564_v29 }
 0x9ee   : > { %3703 = vmatprep.mubr.f32.mxu1 %v3650_v15 }
 0x9f1   : > { %v3654_v12 = vpop.f32.mrb[12].mxu0  ;;  %3704 = vmatmul.mubr.f32.gmra.mrb[10].mxu1 %v3651_v10 }
 0x9f2   : > { %v2577_v22 = vpop.f32.mrb[13].mxu0 }
 0x9f3   : > { %v3655_v23 = vpop.f32.mrb[14].mxu0  ;;  %3706 = vmatprep.mubr.f32.mxu1 %v2577_v22 }
 0x9f4   : > { %v2580_v58 = vpop.f32.mrb[15].mxu0 }
 0x9f5   : > { %3707 = vmatmul.mubr.f32.gmra.mrb[12].mxu1 %v2580_v58 }
 0x9f6   : > { %3709 = vmatprep.mubr.f32.mxu1 %v3654_v12 }
 0x9f9   : > { %3710 = vmatmul.mubr.f32.gmra.mrb[14].mxu1 %v3655_v23 }
 0xab0   : > { %v3690_v56 = vpop.f32.mrb[0].mxu1 }
 0xab1   : > { %v2687_v34 = vadd.f32 %v3690_v56, %v5274_v32  ;;  %v2681_v20 = vpop.f32.mrb[1].mxu1 }
 0xab2   : > { %v2682_v59 = vadd.f32 %v5274_v32, %v2681_v20 }
 0xab3   : > { %v2761_v54 = vmax.f32 %v2687_v34, 0.0 }
 0xab4   : > { %v2760_v52 = vmax.f32 %v2682_v59, 0.0  ;;  %v3693_v31 = vpop.f32.mrb[2].mxu1 }
 0xab5   : > { %v2777_v51 = vmin.f32 %v2761_v54, 50.0  ;;  %v2697_v24 = vadd.f32 %v3693_v31, %v5274_v32  ;;  %v2691_v25 = vpop.f32.mrb[3].mxu1 }
 0xab6   : > { %v2776_v28 = vmin.f32 %v2760_v52, 50.0  ;;  %v2692_v47 = vadd.f32 %v5274_v32, %v2691_v25 }
 0xab7   : > { %2793 = vst [vmem:[#allocation20 + $0x8] sm:$0xff] %v2777_v51  ;;  %v2763_v6 = vmax.f32 %v2697_v24, 0.0 }
 0xab8   : > { %2792 = vst [vmem:[#allocation20] sm:$0xff] %v2776_v28  ;;  %v2762_v19 = vmax.f32 %v2692_v47, 0.0  ;;  %v3696_v48 = vpop.f32.mrb[4].mxu1 }
 0xab9   : > { %v2779_v13 = vmin.f32 %v2763_v6, 50.0  ;;  %v2707_v37 = vadd.f32 %v3696_v48, %v5274_v32  ;;  %v2701_v4 = vpop.f32.mrb[5].mxu1 }
 0xaba   : > { %v2778_v57 = vmin.f32 %v2762_v19, 50.0  ;;  %v2702_v33 = vadd.f32 %v5274_v32, %v2701_v4 }
 0xabb   : > { %2795 = vst [vmem:[#allocation20 + $0x18] sm:$0xff] %v2779_v13  ;;  %v2765_v53 = vmax.f32 %v2707_v37, 0.0 }
 0xabc   : > { %2794 = vst [vmem:[#allocation20 + $0x10] sm:$0xff] %v2778_v57  ;;  %v2764_v63 = vmax.f32 %v2702_v33, 0.0  ;;  %v3699_v44 = vpop.f32.mrb[6].mxu1 }
 0xabd   : > { %v2781_v3 = vmin.f32 %v2765_v53, 50.0  ;;  %v2717_v16 = vadd.f32 %v3699_v44, %v5274_v32  ;;  %v2711_v41 = vpop.f32.mrb[7].mxu1 }
 0xabe   : > { %v2780_v5 = vmin.f32 %v2764_v63, 50.0  ;;  %v2712_v1 = vadd.f32 %v5274_v32, %v2711_v41 }
 0xabf   : > { %2797 = vst [vmem:[#allocation20 + $0x28] sm:$0xff] %v2781_v3  ;;  %v2767_v38 = vmax.f32 %v2717_v16, 0.0 }
 0xac0   : > { %2796 = vst [vmem:[#allocation20 + $0x20] sm:$0xff] %v2780_v5  ;;  %v2766_v39 = vmax.f32 %v2712_v1, 0.0  ;;  %v3702_v46 = vpop.f32.mrb[8].mxu1 }
 0xac1   : > { %v2783_v2 = vmin.f32 %v2767_v38, 50.0  ;;  %v2727_v35 = vadd.f32 %v3702_v46, %v5274_v32  ;;  %v2721_v49 = vpop.f32.mrb[9].mxu1 }
 0xac2   : > { %v2782_v60 = vmin.f32 %v2766_v39, 50.0  ;;  %v2722_v61 = vadd.f32 %v5274_v32, %v2721_v49 }
 0xac3   : > { %2799 = vst [vmem:[#allocation20 + $0x38] sm:$0xff] %v2783_v2  ;;  %v2769_v50 = vmax.f32 %v2727_v35, 0.0 }
 0xac4   : > { %2798 = vst [vmem:[#allocation20 + $0x30] sm:$0xff] %v2782_v60  ;;  %v2768_v55 = vmax.f32 %v2722_v61, 0.0  ;;  %v3705_v27 = vpop.f32.mrb[10].mxu1 }
 0xac5   : > { %v2785_v9 = vmin.f32 %v2769_v50, 50.0  ;;  %v2737_v45 = vadd.f32 %v3705_v27, %v5274_v32  ;;  %v2731_v21 = vpop.f32.mrb[11].mxu1 }
 0xac6   : > { %v2784_v11 = vmin.f32 %v2768_v55, 50.0  ;;  %v2732_v42 = vadd.f32 %v5274_v32, %v2731_v21 }
 0xac7   : > { %2801 = vst [vmem:[#allocation20 + $0x48] sm:$0xff] %v2785_v9  ;;  %v2771_v7 = vmax.f32 %v2737_v45, 0.0 }
 0xac8   : > { %2800 = vst [vmem:[#allocation20 + $0x40] sm:$0xff] %v2784_v11  ;;  %v2770_v8 = vmax.f32 %v2732_v42, 0.0  ;;  %v3708_v26 = vpop.f32.mrb[12].mxu1 }
 0xac9   : > { %v2787_v36 = vmin.f32 %v2771_v7, 50.0  ;;  %v2747_v43 = vadd.f32 %v3708_v26, %v5274_v32  ;;  %v2741_v30 = vpop.f32.mrb[13].mxu1 }
 0xaca   : > { %v2786_v40 = vmin.f32 %v2770_v8, 50.0  ;;  %v2742_v17 = vadd.f32 %v5274_v32, %v2741_v30 }
 0xacb   : > { %2803 = vst [vmem:[#allocation20 + $0x58] sm:$0xff] %v2787_v36  ;;  %v2773_v18 = vmax.f32 %v2747_v43, 0.0 }
 0xacc   : > { %2802 = vst [vmem:[#allocation20 + $0x50] sm:$0xff] %v2786_v40  ;;  %v2772_v62 = vmax.f32 %v2742_v17, 0.0  ;;  %v3711_v14 = vpop.f32.mrb[14].mxu1 }
 0xacd   : > { %v2789_v15 = vmin.f32 %v2773_v18, 50.0  ;;  %v2757_v0 = vadd.f32 %v3711_v14, %v5274_v32  ;;  %v2751_v10 = vpop.f32.mrb[15].mxu1 }
 0xace   : > { %v2788_v29 = vmin.f32 %v2772_v62, 50.0  ;;  %v2752_v12 = vadd.f32 %v5274_v32, %v2751_v10 }
 0xacf   : > { %2805 = vst [vmem:[#allocation20 + $0x68] sm:$0xff] %v2789_v15  ;;  %v2775_v22 = vmax.f32 %v2757_v0, 0.0 }
 0xad0   : > { %2804 = vst [vmem:[#allocation20 + $0x60] sm:$0xff] %v2788_v29  ;;  %v2774_v23 = vmax.f32 %v2752_v12, 0.0 }
 0xad1   : > { %v2791_v58 = vmin.f32 %v2775_v22, 50.0 }
 0xad2   : > { %v2790_v56 = vmin.f32 %v2774_v23, 50.0 }
 0xad3   : > { %2807 = vst [vmem:[#allocation20 + $0x78] sm:$0xff] %v2791_v58 }
 0xad4   : > { %2806 = vst [vmem:[#allocation20 + $0x70] sm:$0xff] %v2790_v56 }
 0xad5 PF: > { %s5443_s14 = sld [smem:[#allocation36_spill]]  ;;  %s4399_s10 = smov [#allocation20]  }
 0xad6   : > { %s2814_s18 = sshll.u32 %s4399_s10, 4  ;;  %s2815_s18 = int_to_ptr.vmem [resolvable:$true] %s2814_s18 }
 0xad7   : > { %s4296_s3 = scalar_lea.vmem %s2815_s18, 2048  ;;  %p4303_p5 = scmp.lt.s32.totalorder %s2815_s18, %s2815_s18 }
 0xad8   : > { %p4297_p13 = scmp.ne.s32.totalorder %s2815_s18, %s4296_s3  ;;  %p4304_p4 = scmp.lt.s32.totalorder %s4296_s3, %s4296_s3 }
 0xada   : > { %p4305_p8 = por %p4304_p4, %p4303_p5 }
 0xadb   : > { %p3853_p11 = scmp.eq.s32.totalorder %s5443_s14, 2 }
 0xadd   : > { %p4298_p2 = pnand %p4297_p13, %p3853_p11 }
 0xadf   : > { %p4299_p10 = pneg %p4298_p2 }
 0xae1   : > { %p4306_p7 = pnand %p4305_p8, %p4299_p10 }
 0xae3   : > { %4309 = shalt.err (!%p4306_p7)
}
 0xae4   : > { %s5444_s25 = sld [smem:[#allocation52_spill]] }
 0xaea   : > { %s4310_s24 = scalar_lea.hbm %s5444_s25, 2048 }
 0xaeb   : > { %p4311_p0 = scmp.ne.s32.totalorder %s5444_s25, %s4310_s24  ;;  %p4316_p3 = scmp.lt.u32.totalorder %s4310_s24, %s5444_s25 }
 0xaed   : > { %p4312_p9 = pnand %p4311_p0, %p3853_p11 }
 0xaef   : > { %p4313_p1 = pneg %p4312_p9 }
 0xaf1   : > { %p4318_p12 = pnand %p4316_p3, %p4313_p1 }
 0xaf3   : > { %4321 = shalt.err (!%p4318_p12)
}
 0xaf4   : > { %s4400_s20 = smov 128   ;;  %s4401_s27 = smov 8  }
 0xaf5   : > { %3807 = dma.vmem_to_hbm [thread:$0]  (%p3853_p11), %s2815_s18, 2048, %s5444_s25, [#allocation8], %s4400_s20, %s4400_s20, %s4401_s27  }
 0xaf6   : > { %4363 = dma.done.wait (%p3853_p11), [#allocation8], 2048  }
 0xaf7   : > { %4365 = vsyncadd (%p3853_p11), [#allocation8], 4294965248 }
 0xaf8 PF: > { %s5445_s10 = sld [smem:[#allocation38_spill]]  ;;  %s5446_s1 = sld [smem:[#allocation34_spill]] }
 0xaf9   : > { %s5447_s20 = sld [smem:[#allocation35_spill]]  ;;  %s5448_s21 = sld [smem:[#allocation39_spill]] }
 0xafe   : > { %p32_p6 = scmp.ge.s32.totalorder %s5445_s10, 5  }
 0xb00   :  { %34 = sbr.rel (!%p32_p6) target bundleno = 25 (0x19), region = 209 }
 0xb07   :  { %2830 = vsyncpa [#allocation7], 1 }
 0xb08   :  { %2832 = vsyncpa [#allocation7 + $0x1], 1 }
 0xb09   :  { %2833 = vsyncpa [#allocation10], 1 }
 0xb0a   :  { %2834 = vsyncpa [#allocation13], 1 }
 0xb0b   :  { %2835 = vsyncpa [#allocation8], 1 }
 0xb0c   :  { %2837 = vsyncpa [#allocation8 + $0x1], 1 }

</bundles_post_ra>
